<compile_context>
chip_gen: v7x
topology: tpu7x:2x2x1
jax: 0.10.0
libtpu: 0.0.40
codegen_flags: <defaults>
</compile_context>

<pallas_src>
import jax
import jax.numpy as jnp
from jax.experimental import pallas as pl
from jax.experimental.pallas import tpu as pltpu

# ---- small, module-consistent shapes --------------------------------------
C = 32            # C_market (characteristics)
Hm = 32           # H_market (hidden market features)
F = 4             # num_market_feature (number of MarketRegimeAttention heads)
T = 16            # seq_len (time_length)
LANES = 128
FC = F * C        # 128 -> lane-dense head-concatenated width
FH = F * Hm       # 128 -> lane-dense output width
W = 2 * LANES     # 256 -> packed K|V / k|k^2 width
MAX_BB = 128      # max problems (independent (T, C) inputs) per grid step

assert FC == LANES and FH == LANES

EPS = float(jnp.finfo(jnp.float32).eps)   # torch.finfo(float32).eps
BN_EPS = 1e-5                             # nn.BatchNorm1d default eps

# ---- packed parameter slab row layout (slab is (N_ROWS_PAD, 256) f32) -------
R_KVW = 0                     # (C, 256)    [K weights | V weights], BN-affine folded in
R_WFC = R_KVW + C             # (FC, FH)    block-diagonal fc weight            (lanes 0:128)
R_QO = R_WFC + FC             # (2*FC, 128) fused score/norm RHS                (lanes 0:128)
R_EXP = R_QO + 2 * FC         # (F, FC)     head -> 32-lane-segment expansion   (lanes 0:128)
R_KVB = R_EXP + F             # (1, 256)    [K biases | V biases], BN-affine folded in
R_BFC = R_KVB + 1             # (1, FH)     fc bias tiled per head
R_QN = R_BFC + 1              # (1, F)      precomputed ||q_f||
N_ROWS = R_QN + 1             # 423
N_ROWS_PAD = ((N_ROWS + 7) // 8) * 8   # 424 (sublane-aligned slab)


# ---- the Pallas kernel: BB problems per grid step, all heads fused ----------
def market_feature_kernel(x_ref, p_ref, o_ref):
    f32 = jnp.float32
    bb = x_ref.shape[0]   # static block size

    # --- static, sublane-aligned slices of the single packed parameter slab ---
    kv_w = p_ref[R_KVW:R_KVW + C, :]                  # (C, 256)   [kw_all | vw_all]
    wfc_bd = p_ref[R_WFC:R_WFC + FC, :FH]             # (FC, FH)
    qo2 = p_ref[R_QO:R_QO + 2 * FC, :LANES]           # (256, 128) [q blkdiag ; ones blkdiag]
    expand = p_ref[R_EXP:R_EXP + F, :FC]              # (F, FC)
    kv_b = p_ref[R_KVB:R_KVB + 1, :]                  # (1, 256)   [kb_all | vb_all]
    bfc = p_ref[R_BFC:R_BFC + 1, :FH]                 # (1, FH)
    q_norm = p_ref[R_QN:R_QN + 1, :F]                 # (1, F)     precomputed ||q_f||

    # --- BatchNorm1d stats (train-mode forward, biased var); affine folded into kv_w/kv_b
    x = x_ref[...].astype(f32)                                    # (BB, T, C)
    mean = jnp.mean(x, axis=1, keepdims=True)                     # (BB, 1, C)
    xc = x - mean
    var = jnp.mean(xc * xc, axis=1, keepdims=True)                # (BB, 1, C)
    z = xc * jax.lax.rsqrt(var + BN_EPS)                          # (BB, T, C)
    z2 = z.reshape(bb * T, C)                                     # (BB*T, C)

    # --- all F heads' K and V in ONE lane-dense (., 256) matmul ----------------
    kv = jnp.dot(z2, kv_w, preferred_element_type=f32) + kv_b     # (BB*T, 256)
    k_all = kv[:, :FC]                                            # (BB*T, FC)
    v_all = kv[:, FC:]                                            # (BB*T, FC)

    # --- per-head scores (q.k) and ||k||^2 in ONE K=256 matmul ------------------
    kk2 = jnp.concatenate([k_all, k_all * k_all], axis=-1)        # (BB*T, 256)
    sc_ks = jnp.dot(kk2, qo2, preferred_element_type=f32)         # (BB*T, 128)
    scores = sc_ks[:, :F]                                         # (BB*T, F)
    k_norm = jnp.sqrt(sc_ks[:, F:2 * F])                          # (BB*T, F)

    scale = jnp.maximum(q_norm * k_norm, EPS)
    s = scores * pl.reciprocal(scale, approx=True)                # cosine-like logits in [-1, 1]
    s = jnp.where(s > 0, s, 0.01 * s)                             # leaky_relu (slope 0.01)

    # --- softmax over the T axis within each problem (exact divide) -------------
    # Logits are bounded by ~1 (|q.k| <= ||q||*||k||) so no max-subtraction is needed.
    e3 = jnp.exp(s).reshape(bb, T, F)
    denom = jnp.sum(e3, axis=1, keepdims=True)                    # (BB, 1, F)
    attn = (e3 / denom).reshape(bb * T, F)                        # (BB*T, F)

    # --- h_f = attn_f @ v_f: broadcast attn per 32-lane head segment, reduce T --
    attn_exp = jnp.dot(attn, expand, preferred_element_type=f32)       # (BB*T, FC)
    h_flat = jnp.sum((attn_exp * v_all).reshape(bb, T, FC), axis=1)    # (BB, FC)

    # --- fc per head via block-diagonal weight; single lane-dense store ---------
    o_ref[...] = jnp.dot(h_flat, wfc_bd, preferred_element_type=f32) + bfc   # (BB, FH)


# ---- host-side parameter packing (one slab = one DMA) -----------------------
def pack_params(p):
    f32 = jnp.float32

    def rowpad(v):
        v = jnp.asarray(v, f32)
        if v.ndim == 1:
            v = v.reshape(1, -1)
        return jnp.pad(v, ((0, 0), (0, W - v.shape[1])))

    gamma = p["gamma"].astype(f32)
    beta = p["beta"].astype(f32)

    # Fold the BN affine into the projections: (z*gamma + beta) @ w + b
    #   = z @ (diag(gamma) @ w) + (beta @ w + b)
    kw_f = [gamma[:, None] * p["kw"][f].astype(f32) for f in range(F)]
    vw_f = [gamma[:, None] * p["vw"][f].astype(f32) for f in range(F)]
    kb_f = [p["kb"][f].astype(f32) + beta @ p["kw"][f].astype(f32) for f in range(F)]
    vb_f = [p["vb"][f].astype(f32) + beta @ p["vw"][f].astype(f32) for f in range(F)]

    kw_all = jnp.concatenate(kw_f, axis=1)                                 # (C, FC)
    vw_all = jnp.concatenate(vw_f, axis=1)                                 # (C, FC)
    kv_w = jnp.concatenate([kw_all, vw_all], axis=1)                       # (C, 256)
    kv_b = jnp.concatenate([jnp.concatenate(kb_f),
                            jnp.concatenate(vb_f)]).reshape(1, W)          # (1, 256)

    wfc_bd = jnp.kron(jnp.eye(F, dtype=f32), p["wfc"].astype(f32))         # (FC, FH)
    ones_bd = jnp.kron(jnp.eye(F, dtype=f32), jnp.ones((C, 1), f32))       # (FC, F)
    q_bd = ones_bd * p["q"].astype(f32).reshape(FC, 1)                     # (FC, F)

    # Fused score/norm RHS: rows 0:FC multiply k_all, rows FC:2FC multiply k_all^2.
    qo2 = jnp.zeros((2 * FC, LANES), f32)
    qo2 = qo2.at[:FC, :F].set(q_bd)
    qo2 = qo2.at[FC:, F:2 * F].set(ones_bd)

    expand = jnp.kron(jnp.eye(F, dtype=f32), jnp.ones((1, C), f32))        # (F, FC)
    bfc_t = jnp.tile(p["bfc"].astype(f32).reshape(1, Hm), (1, F))          # (1, FH)
    q_norm = jnp.linalg.norm(p["q"].astype(f32), axis=1).reshape(1, F)     # precomputed host-side

    slab = jnp.concatenate(
        [rowpad(kv_w), rowpad(wfc_bd), rowpad(qo2), rowpad(expand),
         rowpad(kv_b), rowpad(bfc_t), rowpad(q_norm)], axis=0)
    return jnp.pad(slab, ((0, N_ROWS_PAD - slab.shape[0]), (0, 0)))


# ---- wrapper: batched grid over stacked problems -----------------------------
def _choose_bb(batch, max_bb=MAX_BB):
    """Largest multiple-of-8 block that keeps the grid >= 2 steps when batch allows."""
    if batch <= 8:
        return 8
    half = -(-batch // 2)                    # ceil(batch / 2) -> at least 2 grid steps
    bb = ((half + 7) // 8) * 8               # sublane-aligned
    return max(8, min(max_bb, bb))


def market_feature_extractor(x, slab, *, max_bb=MAX_BB):
    """x: (T, C) single problem or (B, T, C) batch; returns (F, Hm) or (B, F, Hm)."""
    single = (x.ndim == 2)
    xb = x[None] if single else x
    B = xb.shape[0]
    bb = _choose_bb(B, max_bb)
    b_pad = -(-B // bb) * bb
    if b_pad != B:
        xb = jnp.pad(xb, ((0, b_pad - B), (0, 0), (0, 0)))
    xb = xb.astype(jnp.float32)

    out_flat = pl.pallas_call(
        market_feature_kernel,
        out_shape=jax.ShapeDtypeStruct((b_pad, FH), jnp.float32),
        grid_spec=pltpu.PrefetchScalarGridSpec(
            num_scalar_prefetch=0,
            grid=(b_pad // bb,),
            in_specs=[pl.BlockSpec((bb, T, C), lambda i: (i, 0, 0)),
                      pl.BlockSpec((N_ROWS_PAD, W), lambda i: (0, 0))],
            out_specs=pl.BlockSpec((bb, FH), lambda i: (i, 0))),
        compiler_params=pltpu.CompilerParams(
            dimension_semantics=("parallel",),
            vmem_limit_bytes=32 * 1024 * 1024),
    )(xb, slab)

    out = out_flat[:B].reshape(B, F, Hm)
    return out[0] if single else out


# ---- deterministic parameter init (mirrors __init__ shapes; weights pre-transposed) ---
def init_params(key):
    ks = jax.random.split(key, 9)
    bound = 1.0 / jnp.sqrt(C)

    def u(k, shape, lo, hi):
        return jax.random.uniform(k, shape, jnp.float32, lo, hi)

    return dict(
        gamma=1.0 + 0.1 * jax.random.normal(ks[0], (C,), jnp.float32),   # BN weight
        beta=0.1 * jax.random.normal(ks[1], (C,), jnp.float32),          # BN bias
        q=u(ks[2], (F, C), 0.0, 1.0),                                    # torch.rand(C) per head
        kw=u(ks[3], (F, C, C), -bound, bound),                           # (in, out) layout
        kb=u(ks[4], (F, C), -bound, bound),
        vw=u(ks[5], (F, C, C), -bound, bound),
        vb=u(ks[6], (F, C), -bound, bound),
        wfc=u(ks[7], (C, Hm), -bound, bound),                            # fc: (in, out)
        bfc=u(ks[8], (Hm,), -bound, bound),
    )


# ---- pure-JAX reference (mirror of the PyTorch forward) -----------------------
def reference_single(x, p):
    mean = x.mean(axis=0)
    var = jnp.mean((x - mean) ** 2, axis=0)                     # biased, train-mode BN
    xn = (x - mean) / jnp.sqrt(var + BN_EPS) * p["gamma"] + p["beta"]
    heads = []
    for f in range(F):
        q = p["q"][f]
        k = xn @ p["kw"][f] + p["kb"][f]
        v = xn @ p["vw"][f] + p["vb"][f]
        scale = jnp.maximum(jnp.linalg.norm(q) * jnp.linalg.norm(k, axis=1), EPS)
        att = (k @ q) / scale
        att = jnp.where(att > 0, att, 0.01 * att)               # leaky_relu
        att = jax.nn.softmax(att, axis=0)
        heads.append(att @ v)
    h_multi = jnp.stack(heads, axis=0)                          # (F, C)
    return h_multi @ p["wfc"] + p["bfc"]                        # (F, Hm)


if __name__ == "__main__":
    key = jax.random.PRNGKey(0)
    kx, kb16, kb64, kp = jax.random.split(key, 4)

    params = init_params(kp)
    slab = pack_params(params)

    x_single = jax.random.normal(kx, (T, C), jnp.float32)          # (seq_len, C_market)
    x_batch16 = jax.random.normal(kb16, (16, T, C), jnp.float32)   # BB=8, grid=2
    x_batch64 = jax.random.normal(kb64, (64, T, C), jnp.float32)   # BB=32, grid=2

    out_single = market_feature_extractor(x_single, slab)
    out_batch16 = market_feature_extractor(x_batch16, slab)
    out_batch64 = market_feature_extractor(x_batch64, slab)
    jax.block_until_ready((out_single, out_batch16, out_batch64))

    ref_single = reference_single(x_single, params)
    ref_batch16 = jax.vmap(reference_single, in_axes=(0, None))(x_batch16, params)
    ref_batch64 = jax.vmap(reference_single, in_axes=(0, None))(x_batch64, params)

    assert out_single.shape == (F, Hm)
    assert out_batch16.shape == (16, F, Hm)
    assert out_batch64.shape == (64, F, Hm)
    assert jnp.allclose(out_single, ref_single, rtol=2e-3, atol=2e-3)
    assert jnp.allclose(out_batch16, ref_batch16, rtol=2e-3, atol=2e-3)
    assert jnp.allclose(out_batch64, ref_batch64, rtol=2e-3, atol=2e-3)

    print("KERNEL_OK")
</pallas_src>

<mosaic_0001>
module attributes {stable_mosaic.version = 11 : i64} {
  func.func @market_feature_kernel(%arg0: i32, %arg1: memref<8x16x32xf32, #tpu.memory_space<vmem>>, %arg2: memref<424x256xf32, #tpu.memory_space<vmem>>, %arg3: memref<8x128xf32, #tpu.memory_space<vmem>>) attributes {dimension_semantics = [#tpu.dimension_semantics<parallel>], iteration_bounds = array<i64: 1>, scalar_prefetch = 0 : i64, scratch_operands = 0 : i64, tpu.core_type = #tpu.core_type<tc>, window_params = [{transform_indices = @transform_0, window_bounds = array<i64: 8, 16, 32>}, {pipeline_mode = #tpu.pipeline_mode<synchronous>, transform_indices = @transform_1, window_bounds = array<i64: 424, 256>}, {transform_indices = @transform_2, window_bounds = array<i64: 8, 128>}]} {
    %c0 = arith.constant 0 : index
    %c0_0 = arith.constant 0 : index
    %0 = vector.load %arg2[%c0, %c0_0] : memref<424x256xf32, #tpu.memory_space<vmem>>, vector<32x256xf32>
    %c32 = arith.constant 32 : index
    %c0_1 = arith.constant 0 : index
    %1 = vector.load %arg2[%c32, %c0_1] : memref<424x256xf32, #tpu.memory_space<vmem>>, vector<128x128xf32>
    %c160 = arith.constant 160 : index
    %c0_2 = arith.constant 0 : index
    %2 = vector.load %arg2[%c160, %c0_2] : memref<424x256xf32, #tpu.memory_space<vmem>>, vector<256x128xf32>
    %c416 = arith.constant 416 : index
    %c0_3 = arith.constant 0 : index
    %3 = vector.load %arg2[%c416, %c0_3] : memref<424x256xf32, #tpu.memory_space<vmem>>, vector<4x128xf32>
    %c420 = arith.constant 420 : index
    %c0_4 = arith.constant 0 : index
    %4 = vector.load %arg2[%c420, %c0_4] : memref<424x256xf32, #tpu.memory_space<vmem>>, vector<1x256xf32>
    %c421 = arith.constant 421 : index
    %c0_5 = arith.constant 0 : index
    %5 = vector.load %arg2[%c421, %c0_5] : memref<424x256xf32, #tpu.memory_space<vmem>>, vector<1x128xf32>
    %c422 = arith.constant 422 : index
    %c0_6 = arith.constant 0 : index
    %6 = vector.load %arg2[%c422, %c0_6] : memref<424x256xf32, #tpu.memory_space<vmem>>, vector<1x4xf32>
    %c0_7 = arith.constant 0 : index
    %c0_8 = arith.constant 0 : index
    %c0_9 = arith.constant 0 : index
    %7 = vector.load %arg1[%c0_7, %c0_8, %c0_9] : memref<8x16x32xf32, #tpu.memory_space<vmem>>, vector<8x16x32xf32>
    %cst = arith.constant dense<0.000000e+00> : vector<8x32xf32>
    %8 = vector.multi_reduction <add>, %7, %cst [1] : vector<8x16x32xf32> to vector<8x32xf32>
    %9 = vector.shape_cast %8 : vector<8x32xf32> to vector<8x1x32xf32>
    %cst_10 = arith.constant 1.600000e+01 : f32
    %10 = vector.broadcast %cst_10 : f32 to vector<8x1x32xf32>
    %11 = arith.divf %9, %10 : vector<8x1x32xf32>
    %12 = vector.broadcast %11 : vector<8x1x32xf32> to vector<8x16x32xf32>
    %13 = arith.subf %7, %12 : vector<8x16x32xf32>
    %14 = arith.mulf %13, %13 : vector<8x16x32xf32>
    %cst_11 = arith.constant dense<0.000000e+00> : vector<8x32xf32>
    %15 = vector.multi_reduction <add>, %14, %cst_11 [1] : vector<8x16x32xf32> to vector<8x32xf32>
    %16 = vector.shape_cast %15 : vector<8x32xf32> to vector<8x1x32xf32>
    %cst_12 = arith.constant 1.600000e+01 : f32
    %17 = vector.broadcast %cst_12 : f32 to vector<8x1x32xf32>
    %18 = arith.divf %16, %17 : vector<8x1x32xf32>
    %cst_13 = arith.constant 9.99999974E-6 : f32
    %19 = vector.broadcast %cst_13 : f32 to vector<8x1x32xf32>
    %20 = arith.addf %18, %19 : vector<8x1x32xf32>
    %21 = math.rsqrt %20 : vector<8x1x32xf32>
    %22 = vector.broadcast %21 : vector<8x1x32xf32> to vector<8x16x32xf32>
    %23 = arith.mulf %13, %22 : vector<8x16x32xf32>
    %24 = vector.shape_cast %23 : vector<8x16x32xf32> to vector<128x32xf32>
    %cst_14 = arith.constant dense<0.000000e+00> : vector<128x256xf32>
    %25 = tpu.matmul %24, %0, %cst_14 {dimension_numbers = #tpu.dot_dimension_numbers<[1], [0], [0], [1], [0, 0, 1, 1], [], []>} : vector<128x32xf32>, vector<32x256xf32>, vector<128x256xf32> -> vector<128x256xf32>
    %26 = vector.broadcast %4 : vector<1x256xf32> to vector<128x256xf32>
    %27 = arith.addf %25, %26 : vector<128x256xf32>
    %28 = vector.extract_strided_slice %27 {offsets = [0, 0], sizes = [128, 128], strides = [1, 1]} : vector<128x256xf32> to vector<128x128xf32>
    %29 = vector.extract_strided_slice %27 {offsets = [0, 128], sizes = [128, 128], strides = [1, 1]} : vector<128x256xf32> to vector<128x128xf32>
    %30 = arith.mulf %28, %28 : vector<128x128xf32>
    %31 = tpu.concatenate %28, %30 in 1 : vector<128x128xf32>, vector<128x128xf32> -> vector<128x256xf32>
    %cst_15 = arith.constant dense<0.000000e+00> : vector<128x128xf32>
    %32 = tpu.matmul %31, %2, %cst_15 {dimension_numbers = #tpu.dot_dimension_numbers<[1], [0], [0], [1], [0, 0, 1, 1], [], []>} : vector<128x256xf32>, vector<256x128xf32>, vector<128x128xf32> -> vector<128x128xf32>
    %33 = vector.extract_strided_slice %32 {offsets = [0, 0], sizes = [128, 4], strides = [1, 1]} : vector<128x128xf32> to vector<128x4xf32>
    %34 = vector.extract_strided_slice %32 {offsets = [0, 4], sizes = [128, 4], strides = [1, 1]} : vector<128x128xf32> to vector<128x4xf32>
    %35 = math.sqrt %34 : vector<128x4xf32>
    %36 = vector.broadcast %6 : vector<1x4xf32> to vector<128x4xf32>
    %37 = arith.mulf %36, %35 : vector<128x4xf32>
    %cst_16 = arith.constant 1.1920929E-7 : f32
    %38 = vector.broadcast %cst_16 : f32 to vector<128x4xf32>
    %39 = arith.maximumf %37, %38 : vector<128x4xf32>
    %40 = tpu.reciprocal %39 {approx = true} : vector<128x4xf32> -> vector<128x4xf32>
    %41 = arith.mulf %33, %40 : vector<128x4xf32>
    %cst_17 = arith.constant 0.000000e+00 : f32
    %42 = vector.broadcast %cst_17 : f32 to vector<128x4xf32>
    %43 = arith.cmpf ogt, %41, %42 : vector<128x4xf32>
    %cst_18 = arith.constant 0.00999999977 : f32
    %44 = vector.broadcast %cst_18 : f32 to vector<128x4xf32>
    %45 = arith.mulf %44, %41 : vector<128x4xf32>
    %46 = arith.select %43, %41, %45 : vector<128x4xi1>, vector<128x4xf32>
    %47 = math.exp %46 : vector<128x4xf32>
    %48 = vector.shape_cast %47 : vector<128x4xf32> to vector<8x16x4xf32>
    %cst_19 = arith.constant dense<0.000000e+00> : vector<8x4xf32>
    %49 = vector.multi_reduction <add>, %48, %cst_19 [1] : vector<8x16x4xf32> to vector<8x4xf32>
    %50 = vector.shape_cast %49 : vector<8x4xf32> to vector<8x1x4xf32>
    %51 = vector.broadcast %50 : vector<8x1x4xf32> to vector<8x16x4xf32>
    %52 = arith.divf %48, %51 : vector<8x16x4xf32>
    %53 = vector.shape_cast %52 : vector<8x16x4xf32> to vector<128x4xf32>
    %cst_20 = arith.constant dense<0.000000e+00> : vector<128x128xf32>
    %54 = tpu.matmul %53, %3, %cst_20 {dimension_numbers = #tpu.dot_dimension_numbers<[1], [0], [0], [1], [0, 0, 1, 1], [], []>} : vector<128x4xf32>, vector<4x128xf32>, vector<128x128xf32> -> vector<128x128xf32>
    %55 = arith.mulf %54, %29 : vector<128x128xf32>
    %56 = vector.shape_cast %55 : vector<128x128xf32> to vector<8x16x128xf32>
    %cst_21 = arith.constant dense<0.000000e+00> : vector<8x128xf32>
    %57 = vector.multi_reduction <add>, %56, %cst_21 [1] : vector<8x16x128xf32> to vector<8x128xf32>
    %cst_22 = arith.constant dense<0.000000e+00> : vector<8x128xf32>
    %58 = tpu.matmul %57, %1, %cst_22 {dimension_numbers = #tpu.dot_dimension_numbers<[1], [0], [0], [1], [0, 0, 1, 1], [], []>} : vector<8x128xf32>, vector<128x128xf32>, vector<8x128xf32> -> vector<8x128xf32>
    %59 = vector.broadcast %5 : vector<1x128xf32> to vector<8x128xf32>
    %60 = arith.addf %58, %59 : vector<8x128xf32>
    %c0_23 = arith.constant 0 : index
    %c0_24 = arith.constant 0 : index
    %61 = vector.load %arg3[%c0_23, %c0_24] : memref<8x128xf32, #tpu.memory_space<vmem>>, vector<8x128xf32>
    tpu.vector_store %arg3[%c0_23, %c0_24], %60 {strides = array<i32>} : memref<8x128xf32, #tpu.memory_space<vmem>>, vector<8x128xf32>,
    return
  }
  func.func @transform_0(%arg0: i32) -> (i32, i32, i32) {
    %c0_i32 = arith.constant 0 : i32
    %c0_i32_0 = arith.constant 0 : i32
    %c0_i32_1 = arith.constant 0 : i32
    return %arg0, %c0_i32, %c0_i32_0 : i32, i32, i32
  }
  func.func @transform_1(%arg0: i32) -> (i32, i32) {
    %c0_i32 = arith.constant 0 : i32
    %c0_i32_0 = arith.constant 0 : i32
    %c0_i32_1 = arith.constant 0 : i32
    return %c0_i32, %c0_i32_0 : i32, i32
  }
  func.func @transform_2(%arg0: i32) -> (i32, i32) {
    %c0_i32 = arith.constant 0 : i32
    %c0_i32_0 = arith.constant 0 : i32
    return %arg0, %c0_i32 : i32, i32
  }
}

</mosaic_0001>

<bundles_post_ra>
// kernel: tpu_custom_call.1
= control target key start
LH: loop header
LB: loop body
LE: loop exit
PB: predicated region body
PF: predicated region fallthrough
CT: control target
= control target key end

     0   :  { %7 = vsyncpa [#allocation3], 0  ;;  %s2621_s0 = inlined_call_operand.hbm [shape: f32[8,16,32], index: 0, kind: input, shape index: {}]   ;;  %s2622_s1 = inlined_call_operand.hbm [shape: f32[424,256], index: 1, kind: input, shape index: {}]   ;;  %s2623_s2 = inlined_call_operand.hbm [shape: f32[8,128], index: 2, kind: output, shape index: {}]  }
   0x1   :  { %8 = vsyncpa [#allocation6], 0 }
   0x2   :  { %9 = vsyncpa [#allocation4], 0  ;;  %s2004_s9 = smov [#allocation2]   ;;  %s1932_s13 = scalar_lea.hbm %s2621_s0, 2048 }
   0x3   :  { %s15_s10 = sshll.u32 %s2004_s9, 4  ;;  %p1933_p0 = scmp.ne.s32.totalorder %s2621_s0, %s1932_s13  ;;  %s16_s10 = int_to_ptr.vmem [resolvable:$true] %s15_s10 }
   0x4   :  { %p1936_p1 = scmp.lt.u32.totalorder %s1932_s13, %s2621_s0 }
   0x6   :  { %p1938_p2 = pnand %p1936_p1, %p1933_p0 }
   0x8   :  { %1941 = shalt.err (!%p1938_p2)
}
   0x9   :  { %s1942_s18 = scalar_lea.vmem %s16_s10, 2048  ;;  %p1947_p4 = scmp.lt.s32.totalorder %s16_s10, %s16_s10 }
   0xa   :  { %p1943_p3 = scmp.ne.s32.totalorder %s16_s10, %s1942_s18  ;;  %p1948_p5 = scmp.lt.s32.totalorder %s1942_s18, %s1942_s18 }
   0xc   :  { %p1949_p6 = por %p1948_p5, %p1947_p4 }
   0xe   :  { %p1950_p7 = pnand %p1949_p6, %p1943_p3 }
  0x10   :  { %1953 = shalt.err (!%p1950_p7)
}
  0x11   :  { %s2005_s19 = smov 128   ;;  %s2006_s20 = smov 8  }
  0x12   :  { %21 = dma.hbm_to_vmem [thread:$0]  %s2621_s0, 2048, %s16_s10, [#allocation3], %s2005_s19, %s2005_s19, %s2006_s20  }
  0x13   :  { %s2007_s23 = smov [#allocation5]   ;;  %s1954_s27 = scalar_lea.hbm %s2622_s1, 13568 }
  0x14   :  { %s27_s24 = sshll.u32 %s2007_s23, 4  ;;  %p1955_p8 = scmp.ne.s32.totalorder %s2622_s1, %s1954_s27  ;;  %s28_s24 = int_to_ptr.vmem [resolvable:$true] %s27_s24 }
  0x15   :  { %p1958_p9 = scmp.lt.u32.totalorder %s1954_s27, %s2622_s1 }
  0x17   :  { %p1960_p10 = pnand %p1958_p9, %p1955_p8 }
  0x19   :  { %1963 = shalt.err (!%p1960_p10)
}
  0x1a   :  { %s1964_s4 = scalar_lea.vmem %s28_s24, 13568  ;;  %p1969_p12 = scmp.lt.s32.totalorder %s28_s24, %s28_s24 }
  0x1b   :  { %p1965_p11 = scmp.ne.s32.totalorder %s28_s24, %s1964_s4  ;;  %p1970_p13 = scmp.lt.s32.totalorder %s1964_s4, %s1964_s4 }
  0x1d   :  { %p1971_p0 = por %p1970_p13, %p1969_p12 }
  0x1f   :  { %p1972_p1 = pnand %p1971_p0, %p1965_p11 }
  0x21   :  { %1975 = shalt.err (!%p1972_p1)
}
  0x22   :  { %s2008_s0 = smov 256   ;;  %s2009_s5 = smov 16  }
  0x23   :  { %33 = dma.hbm_to_vmem [thread:$0]  %s2622_s1, 13568, %s28_s24, [#allocation6], %s2008_s0, %s2008_s0, %s2009_s5  }
  0x24   :  { %1998 = dma.done.wait [#allocation3], 2048  }
  0x25   :  { %1999 = vsyncadd [#allocation3], 4294965248 }
  0x26   :  { %2000 = dma.done.wait [#allocation6], 13568  }
  0x27   :  { %2001 = vsyncadd [#allocation6], 4294953728  ;;  %v2010_v0 = vmov 0.0   ;;  %v41_v1 = vld [vmem:[#allocation5 + $0x8] sm:$0xff]  ;;  %v43_v2 = vld [vmem:[#allocation5 + $0x18] sm:$0xff]  ;;  %vm117_vm0 = vcmask 261120  }
  0x28   :  { %466 = vmatprep.mubr.f32.mxu0 %v2010_v0  ;;  %v40_v3 = vld [vmem:[#allocation5] sm:$0xff]  ;;  %v1728_v4 = vpack.c.bf16 %v43_v2, %v41_v1  ;;  %v42_v5 = vld [vmem:[#allocation5 + $0x10] sm:$0xff]  ;;  %v45_v6 = vld [vmem:[#allocation5 + $0x28] sm:$0xff]  ;;  %s2011_s1 = smov 124   ;;  %s2014_s8 = smov [#allocation7]  }
  0x29   :  { %v47_v7 = vld [vmem:[#allocation5 + $0x38] sm:$0xff]  ;;  %v1730_v8 = vpack.c.bf16 %v42_v5, %v40_v3  ;;  %v44_v10 = vld [vmem:[#allocation5 + $0x20] sm:$0xff]  ;;  %v46_v11 = vld [vmem:[#allocation5 + $0x30] sm:$0xff]  ;;  %s1510_s9 = sshll.u32 %s2014_s8, 4  ;;  %s1511_s9 = int_to_ptr.vmem [resolvable:$true] %s1510_s9 }
  0x2a   :  { %v1732_v9 = vpack.c.bf16 %v47_v7, %v45_v6  ;;  %v2055_v12 = vld [vmem:[#allocation2] sm:$0xff]  ;;  %1729 = vmatprep.subr.bf16.mxu0 %v1728_v4  ;;  %v2057_v13 = vld [vmem:[#allocation2 + $0x8] sm:$0xff]  ;;  %v2061_v15 = vld [vmem:[#allocation2 + $0x10] sm:$0xff]  ;;  %v1734_v17 = vpack.c.bf16 %v46_v11, %v44_v10  ;;  %s1976_s10 = scalar_lea.vmem %s1511_s9, 128  ;;  %p1981_p3 = scmp.lt.s32.totalorder %s1511_s9, %s1511_s9 }
  0x2b   :  { %v118_v14 = vsel %vm117_vm0, %v2055_v12, 0.0  ;;  %v2063_v16 = vld [vmem:[#allocation2 + $0x18] sm:$0xff]  ;;  %1731 = vmatpush1.bf16.msra.mxu0 %v1730_v8  ;;  %v119_v18 = vsel %vm117_vm0, %v2057_v13, 0.0  ;;  %v127_v19 = vsel %vm117_vm0, %v2061_v15, 0.0  ;;  %v2071_v21 = vld [vmem:[#allocation2 + $0x20] sm:$0xff]  ;;  %v2073_v22 = vld [vmem:[#allocation2 + $0x28] sm:$0xff]  ;;  %p1977_p2 = scmp.ne.s32.totalorder %s1511_s9, %s1976_s10  ;;  %p1982_p4 = scmp.lt.s32.totalorder %s1976_s10, %s1976_s10 }
  0x2c   :  { %v128_v20 = vsel %vm117_vm0, %v2063_v16, 0.0  ;;  %v2075_v23 = vld [vmem:[#allocation2 + $0x30] sm:$0xff]  ;;  %1733 = vmatprep.subr.bf16.mxu0 %v1732_v9  ;;  %v120_v24 = vadd.f32 %v119_v18, %v118_v14  ;;  %v136_v26 = vsel %vm117_vm0, %v2071_v21, 0.0  ;;  %v137_v27 = vsel %vm117_vm0, %v2073_v22, 0.0  ;;  %v2081_v28 = vld [vmem:[#allocation2 + $0x38] sm:$0xff]  ;;  %v2083_v29 = vld [vmem:[#allocation2 + $0x40] sm:$0xff] }
  0x2d   :  { %v129_v25 = vadd.f32 %v128_v20, %v127_v19  ;;  %v2085_v30 = vld [vmem:[#allocation2 + $0x48] sm:$0xff]  ;;  %v138_v31 = vadd.f32 %v137_v27, %v136_v26  ;;  %v145_v32 = vsel %vm117_vm0, %v2075_v23, 0.0  ;;  %v146_v33 = vsel %vm117_vm0, %v2081_v28, 0.0  ;;  %v2093_v35 = vld [vmem:[#allocation2 + $0x50] sm:$0xff]  ;;  %v2095_v36 = vld [vmem:[#allocation2 + $0x58] sm:$0xff]  ;;  %p1983_p5 = por %p1982_p4, %p1981_p3 }
  0x2e   :  { %v154_v34 = vsel %vm117_vm0, %v2083_v29, 0.0  ;;  %v121_v37 = vrot.slane %v120_v24, 4  ;;  %v147_v39 = vadd.f32 %v146_v33, %v145_v32  ;;  %v155_v40 = vsel %vm117_vm0, %v2085_v30, 0.0  ;;  %v2099_v41 = vld [vmem:[#allocation2 + $0x60] sm:$0xff]  ;;  %v2101_v42 = vld [vmem:[#allocation2 + $0x68] sm:$0xff]  ;;  %v2111_v59 = vld [vmem:[#allocation2 + $0x70] sm:$0xff] }
  0x2f   :  { %v130_v38 = vrot.slane %v129_v25, 4  ;;  %1735 = vmatpush1.bf16.msra.mxu0 %v1734_v17  ;;  %v139_v43 = vrot.slane %v138_v31, 4  ;;  %v156_v44 = vadd.f32 %v155_v40, %v154_v34  ;;  %v163_v45 = vsel %vm117_vm0, %v2093_v35, 0.0  ;;  %v2113_v4 = vld [vmem:[#allocation2 + $0x78] sm:$0xff]  ;;  %p1984_p6 = pnand %p1983_p5, %p1977_p2 }
  0x30   :  { %v164_v46 = vsel %vm117_vm0, %v2095_v36, 0.0  ;;  %v122_v47 = vadd.f32 %v121_v37, %v120_v24  ;;  %v148_v49 = vrot.slane %v147_v39, 4  ;;  %v172_v53 = vsel %vm117_vm0, %v2099_v41, 0.0 }
  0x31   :  { %v131_v48 = vadd.f32 %v130_v38, %v129_v25  ;;  %v165_v50 = vadd.f32 %v164_v46, %v163_v45  ;;  %v140_v51 = vadd.f32 %v139_v43, %v138_v31  ;;  %v157_v52 = vrot.slane %v156_v44, 4 }
  0x32   :  { %v173_v54 = vsel %vm117_vm0, %v2101_v42, 0.0  ;;  %v123_v55 = vrot.slane %v122_v47, 2  ;;  %v149_v57 = vadd.f32 %v148_v49, %v147_v39  ;;  %v181_v8 = vsel %vm117_vm0, %v2111_v59, 0.0 }
  0x33   :  { %v132_v56 = vrot.slane %v131_v48, 2  ;;  %v166_v58 = vrot.slane %v165_v50, 4  ;;  %v141_v60 = vrot.slane %v140_v51, 2  ;;  %v158_v61 = vadd.f32 %v157_v52, %v156_v44 }
  0x34   :  { %v174_v62 = vadd.f32 %v173_v54, %v172_v53  ;;  %v124_v63 = vadd.f32 %v123_v55, %v122_v47  ;;  %v150_v2 = vrot.slane %v149_v57, 2  ;;  %v182_v20 = vsel %vm117_vm0, %v2113_v4, 0.0 }
  0x35   :  { %v133_v1 = vadd.f32 %v132_v56, %v131_v48  ;;  %v167_v3 = vadd.f32 %v166_v58, %v165_v50  ;;  %v142_v5 = vadd.f32 %v141_v60, %v140_v51  ;;  %v159_v6 = vrot.slane %v158_v61, 2 }
  0x36   :  { %v175_v7 = vrot.slane %v174_v62, 4  ;;  %v125_v9 = vrot.slane %v124_v63, 1  ;;  %v151_v11 = vadd.f32 %v150_v2, %v149_v57  ;;  %v2119_v39 = vadd.f32 %v182_v20, %v181_v8 }
  0x37   :  { %v134_v10 = vrot.slane %v133_v1, 1  ;;  %v168_v14 = vrot.slane %v167_v3, 2  ;;  %v143_v17 = vrot.slane %v142_v5, 1  ;;  %v160_v18 = vadd.f32 %v159_v6, %v158_v61 }
  0x38   :  { %v176_v19 = vadd.f32 %v175_v7, %v174_v62  ;;  %v126_v24 = vadd.f32 %v125_v9, %v124_v63  ;;  %v152_v26 = vrot.slane %v151_v11, 1 }
  0x39   :  { %v135_v25 = vadd.f32 %v134_v10, %v133_v1  ;;  %v169_v27 = vadd.f32 %v168_v14, %v167_v3  ;;  %v144_v31 = vadd.f32 %v143_v17, %v142_v5  ;;  %v161_v32 = vrot.slane %v160_v18, 1 }
  0x3a   :  { %v177_v33 = vrot.slane %v176_v19, 2  ;;  %v191_v34 = vmul.f32 0.0625, %v126_v24  ;;  %v153_v38 = vadd.f32 %v152_v26, %v151_v11 }
  0x3b   :  { %v192_v37 = vmul.f32 0.0625, %v135_v25  ;;  %v193_v40 = vmul.f32 0.0625, %v144_v31  ;;  %v162_v43 = vadd.f32 %v161_v32, %v160_v18  ;;  %v170_v44 = vrot.slane %v169_v27, 1 }
  0x3c   :  { %v178_v45 = vadd.f32 %v177_v33, %v176_v19  ;;  %v2122_v46 = vsub.f32 %v2055_v12, %v191_v34  ;;  %v2125_v47 = vsub.f32 %v2057_v13, %v191_v34  ;;  %v194_v52 = vmul.f32 0.0625, %v153_v38 }
  0x3d   :  { %v2128_v48 = vsub.f32 %v2061_v15, %v192_v37  ;;  %v2131_v49 = vsub.f32 %v2063_v16, %v192_v37  ;;  %v2134_v50 = vsub.f32 %v2071_v21, %v193_v40  ;;  %v2137_v51 = vsub.f32 %v2073_v22, %v193_v40 }
  0x3e   :  { %v195_v53 = vmul.f32 0.0625, %v162_v43  ;;  %v215_v12 = vmul.f32 %v2122_v46, %v2122_v46  ;;  %v216_v13 = vmul.f32 %v2125_v47, %v2125_v47  ;;  %v2152_v54 = vsub.f32 %v2075_v23, %v194_v52 }
  0x3f   :  { %v217_v15 = vmul.f32 %v2128_v48, %v2128_v48  ;;  %v218_v16 = vmul.f32 %v2131_v49, %v2131_v49  ;;  %v219_v21 = vmul.f32 %v2134_v50, %v2134_v50  ;;  %v220_v22 = vmul.f32 %v2137_v51, %v2137_v51 }
  0x40   :  { %v2155_v55 = vsub.f32 %v2081_v28, %v194_v52  ;;  %v231_v56 = vsel %vm117_vm0, %v215_v12, 0.0  ;;  %v232_v57 = vsel %vm117_vm0, %v216_v13, 0.0  ;;  %v221_v23 = vmul.f32 %v2152_v54, %v2152_v54 }
  0x41   :  { %v240_v58 = vsel %vm117_vm0, %v217_v15, 0.0  ;;  %v241_v60 = vsel %vm117_vm0, %v218_v16, 0.0  ;;  %v233_v61 = vadd.f32 %v232_v57, %v231_v56  ;;  %v249_v63 = vsel %vm117_vm0, %v219_v21, 0.0 }
  0x42   :  { %v242_v62 = vadd.f32 %v241_v60, %v240_v58  ;;  %v250_v1 = vsel %vm117_vm0, %v220_v22, 0.0  ;;  %v222_v28 = vmul.f32 %v2155_v55, %v2155_v55  ;;  %v2168_v3 = vsub.f32 %v2083_v29, %v195_v53 }
  0x43   :  { %v251_v2 = vadd.f32 %v250_v1, %v249_v63  ;;  %v234_v5 = vrot.slane %v233_v61, 4  ;;  %v2171_v7 = vsub.f32 %v2085_v30, %v195_v53  ;;  %v171_v8 = vadd.f32 %v170_v44, %v169_v27 }
  0x44   :  { %v243_v6 = vrot.slane %v242_v62, 4  ;;  %v258_v10 = vsel %vm117_vm0, %v221_v23, 0.0  ;;  %v259_v11 = vsel %vm117_vm0, %v222_v28, 0.0  ;;  %v223_v14 = vmul.f32 %v2168_v3, %v2168_v3 }
  0x45   :  { %v252_v9 = vrot.slane %v251_v2, 4  ;;  %v235_v17 = vadd.f32 %v234_v5, %v233_v61  ;;  %v260_v19 = vadd.f32 %v259_v11, %v258_v10  ;;  %v224_v29 = vmul.f32 %v2171_v7, %v2171_v7  ;;  %v80_v5 = vld [vmem:[#allocation5 + $0x240] sm:$0xff] }
  0x46   :  { %v244_v18 = vadd.f32 %v243_v6, %v242_v62  ;;  %v267_v24 = vsel %vm117_vm0, %v223_v14, 0.0  ;;  %v196_v30 = vmul.f32 0.0625, %v171_v8  ;;  %v179_v25 = vrot.slane %v178_v45, 1  ;;  %v81_v6 = vld [vmem:[#allocation5 + $0x250] sm:$0xff] }
  0x47   :  { %v253_v20 = vadd.f32 %v252_v9, %v251_v2  ;;  %v236_v26 = vrot.slane %v235_v17, 2  ;;  %v261_v31 = vrot.slane %v260_v19, 4  ;;  %v268_v32 = vsel %vm117_vm0, %v224_v29, 0.0  ;;  %v64_v9 = vld [vmem:[#allocation5 + $0x140] sm:$0xff]  ;;  %v65_v14 = vld [vmem:[#allocation5 + $0x150] sm:$0xff] }
  0x48   :  { %v245_v27 = vrot.slane %v244_v18, 2  ;;  %v2182_v34 = vsub.f32 %v2093_v35, %v196_v30  ;;  %v2185_v37 = vsub.f32 %v2095_v36, %v196_v30  ;;  %v269_v43 = vadd.f32 %v268_v32, %v267_v24  ;;  %v66_v24 = vld [vmem:[#allocation5 + $0x160] sm:$0xff]  ;;  %v67_v30 = vld [vmem:[#allocation5 + $0x170] sm:$0xff] }
  0x49   :  { %v254_v33 = vrot.slane %v253_v20, 2  ;;  %v237_v38 = vadd.f32 %v236_v26, %v235_v17  ;;  %v180_v44 = vadd.f32 %v179_v25, %v178_v45  ;;  %v262_v52 = vadd.f32 %v261_v31, %v260_v19  ;;  %v82_v17 = vld [vmem:[#allocation5 + $0x260] sm:$0xff]  ;;  %v85_v32 = vld [vmem:[#allocation5 + $0x290] sm:$0xff] }
  0x4a   :  { %v246_v40 = vadd.f32 %v245_v27, %v244_v18  ;;  %v184_v15 = vrot.slane %v2119_v39, 4  ;;  %v225_v16 = vmul.f32 %v2182_v34, %v2182_v34  ;;  %v226_v35 = vmul.f32 %v2185_v37, %v2185_v37  ;;  %v83_v18 = vld [vmem:[#allocation5 + $0x270] sm:$0xff]  ;;  %v84_v31 = vld [vmem:[#allocation5 + $0x280] sm:$0xff] }
  0x4b   :  { %v238_v53 = vrot.slane %v237_v38, 1  ;;  %v255_v13 = vadd.f32 %v254_v33, %v253_v20  ;;  %v197_v21 = vmul.f32 0.0625, %v180_v44  ;;  %v270_v56 = vrot.slane %v269_v43, 4 }
  0x4c   :  { %v247_v12 = vrot.slane %v246_v40, 1  ;;  %v263_v57 = vrot.slane %v262_v52, 2  ;;  %v185_v61 = vadd.f32 %v184_v15, %v2119_v39  ;;  %v276_v62 = vsel %vm117_vm0, %v225_v16, 0.0  ;;  %v68_v16 = vld [vmem:[#allocation5 + $0x180] sm:$0xff] }
  0x4d   :  { %v239_v22 = vadd.f32 %v238_v53, %v237_v38  ;;  %v256_v45 = vrot.slane %v255_v13, 1  ;;  %v277_v63 = vsel %vm117_vm0, %v226_v35, 0.0  ;;  %v2196_v1 = vsub.f32 %v2099_v41, %v197_v21  ;;  %v69_v35 = vld [vmem:[#allocation5 + $0x190] sm:$0xff] }
  0x4e   :  { %v248_v36 = vadd.f32 %v247_v12, %v246_v40  ;;  %v2199_v2 = vsub.f32 %v2101_v42, %v197_v21  ;;  %v271_v28 = vadd.f32 %v270_v56, %v269_v43  ;;  %v264_v8 = vadd.f32 %v263_v57, %v262_v52  ;;  %v86_v57 = vld [vmem:[#allocation5 + $0x2a0] sm:$0xff] }
  0x4f   :  { %v303_v58 = vmul.f32 0.0625, %v239_v22  ;;  %v257_v11 = vadd.f32 %v256_v45, %v255_v13  ;;  %v278_v39 = vadd.f32 %v277_v63, %v276_v62  ;;  %v227_v41 = vmul.f32 %v2196_v1, %v2196_v1 }
  0x50   :  { %v304_v60 = vmul.f32 0.0625, %v248_v36  ;;  %v228_v42 = vmul.f32 %v2199_v2, %v2199_v2  ;;  %v186_v19 = vrot.slane %v185_v61, 2  ;;  %v1736_v29 = vpack.c.bf16 %v81_v6, %v80_v5  ;;  %v70_v6 = vld [vmem:[#allocation5 + $0x1a0] sm:$0xff] }
  0x51   :  { %v311_v23 = vadd.f32 1e-05, %v303_v58  ;;  %v272_v20 = vrot.slane %v271_v28, 2  ;;  %v1738_v26 = vpack.c.bf16 %v65_v14, %v64_v9  ;;  %v1740_v27 = vpack.c.bf16 %v83_v18, %v82_v17  ;;  %v87_v58 = vld [vmem:[#allocation5 + $0x2b0] sm:$0xff] }
  0x52   :  { %v312_v10 = vadd.f32 1e-05, %v304_v60  ;;  %v187_v25 = vadd.f32 %v186_v19, %v185_v61  ;;  %1737 = vmatprep.subr.bf16.mxu1 %v1736_v29  ;;  %v305_v33 = vmul.f32 0.0625, %v257_v11  ;;  %v265_v38 = vrot.slane %v264_v8, 1  ;;  %v89_v14 = vld [vmem:[#allocation5 + $0x2d0] sm:$0xff] }
  0x53   :  { %1803 = vrsqrt.f32 %v311_v23  ;;  %v279_v40 = vrot.slane %v278_v39, 4  ;;  %v285_v43 = vsel %vm117_vm0, %v227_v41, 0.0  ;;  %v286_v44 = vsel %vm117_vm0, %v228_v42, 0.0  ;;  %1739 = vmatpush3.bf16.msra.mxu1 %v1738_v26 }
  0x54   :  { %1805 = vrsqrt.f32 %v312_v10  ;;  %v188_v52 = vrot.slane %v187_v25, 1  ;;  %v1742_v53 = vpack.c.bf16 %v67_v30, %v66_v24  ;;  %v273_v12 = vadd.f32 %v272_v20, %v271_v28  ;;  %1741 = vmatprep.subr.bf16.mxu1 %v1740_v27  ;;  %v72_v20 = vld [vmem:[#allocation5 + $0x1c0] sm:$0xff] }
  0x55   :  { %v1744_v13 = vpack.c.bf16 %v85_v32, %v84_v31  ;;  %v313_v21 = vadd.f32 1e-05, %v305_v33  ;;  %v266_v22 = vadd.f32 %v265_v38, %v264_v8  ;;  %v280_v36 = vadd.f32 %v279_v40, %v278_v39  ;;  %v71_v8 = vld [vmem:[#allocation5 + $0x1b0] sm:$0xff]  ;;  %v88_v39 = vld [vmem:[#allocation5 + $0x2c0] sm:$0xff] }
  0x56   :  { %v189_v15 = vadd.f32 %v188_v52, %v187_v25  ;;  %v287_v56 = vadd.f32 %v286_v44, %v285_v43  ;;  %v274_v61 = vrot.slane %v273_v12, 1  ;;  %v1746_v62 = vpack.c.bf16 %v69_v35, %v68_v16  ;;  %v90_v27 = vld [vmem:[#allocation5 + $0x2e0] sm:$0xff]  ;;  %v91_v31 = vld [vmem:[#allocation5 + $0x2f0] sm:$0xff] }
  0x57   :  { %1743 = vmatpush3.bf16.msra.mxu1 %v1742_v53  ;;  %v1748_v5 = vpack.c.bf16 %v87_v58, %v86_v57  ;;  %1807 = vrsqrt.f32 %v313_v21  ;;  %v306_v9 = vmul.f32 0.0625, %v266_v22  ;;  %v281_v10 = vrot.slane %v280_v36, 2  ;;  %v74_v43 = vld [vmem:[#allocation5 + $0x1e0] sm:$0xff]  ;;  %v75_v44 = vld [vmem:[#allocation5 + $0x1f0] sm:$0xff] }
  0x58   :  { %v198_v60 = vmul.f32 0.0625, %v189_v15  ;;  %1745 = vmatprep.subr.bf16.mxu1 %v1744_v13  ;;  %v288_v11 = vrot.slane %v287_v56, 4  ;;  %v1750_v18 = vpack.c.bf16 %v71_v8, %v70_v6  ;;  %v275_v41 = vadd.f32 %v274_v61, %v273_v12  ;;  %v92_v13 = vld [vmem:[#allocation5 + $0x300] sm:$0xff]  ;;  %v93_v15 = vld [vmem:[#allocation5 + $0x310] sm:$0xff] }
  0x59   :  { %v1752_v29 = vpack.c.bf16 %v89_v14, %v88_v39  ;;  %v314_v24 = vadd.f32 1e-05, %v306_v9  ;;  %v282_v30 = vadd.f32 %v281_v10, %v280_v36  ;;  %v1756_v40 = vpack.c.bf16 %v91_v31, %v90_v27  ;;  %v76_v22 = vld [vmem:[#allocation5 + $0x200] sm:$0xff]  ;;  %v77_v36 = vld [vmem:[#allocation5 + $0x210] sm:$0xff] }
  0x5a   :  { %v2209_v23 = vsub.f32 %v2111_v59, %v198_v60  ;;  %v2212_v28 = vsub.f32 %v2113_v4, %v198_v60  ;;  %v289_v25 = vadd.f32 %v288_v11, %v287_v56  ;;  %v307_v38 = vmul.f32 0.0625, %v275_v41  ;;  %v98_v27 = vld [vmem:[#allocation5 + $0x344] ss:$8 sm:$0x3] }
  0x5b   :  { %1747 = vmatpush3.bf16.msra.mxu1 %v1746_v62  ;;  %1809 = vrsqrt.f32 %v314_v24  ;;  %v283_v52 = vrot.slane %v282_v30, 1  ;;  %v1758_v35 = vpack.c.bf16 %v75_v44, %v74_v43  ;;  %v1760_v21 = vpack.c.bf16 %v93_v15, %v92_v13  ;;  %v79_v24 = vld [vmem:[#allocation5 + $0x230] sm:$0xff] }
  0x5c   :  { %v229_v59 = vmul.f32 %v2209_v23, %v2209_v23  ;;  %v230_v4 = vmul.f32 %v2212_v28, %v2212_v28  ;;  %1749 = vmatprep.subr.bf16.mxu1 %v1748_v5  ;;  %v290_v53 = vrot.slane %v289_v25, 2  ;;  %v315_v56 = vadd.f32 1e-05, %v307_v38 }
  0x5d   :  { %v1804_v45 = vpop.eup %1803  ;;  %v284_v57 = vadd.f32 %v283_v52, %v282_v30 }
  0x5e   :  { %v327_v63 = vmul.f32 %v1804_v45, %v2122_v46  ;;  %v328_v17 = vmul.f32 %v1804_v45, %v2125_v47  ;;  %v1806_v46 = vpop.eup %1805  ;;  %v294_v42 = vsel %vm117_vm0, %v229_v59, 0.0  ;;  %v295_v19 = vsel %vm117_vm0, %v230_v4, 0.0  ;;  %v73_v47 = vld [vmem:[#allocation5 + $0x1d0] sm:$0xff] }
  0x5f   :  { %v296_v26 = vadd.f32 %v295_v19, %v294_v42  ;;  %v329_v32 = vmul.f32 %v1806_v46, %v2128_v48  ;;  %1751 = vmatpush3.bf16.msra.mxu1 %v1750_v18  ;;  %v1754_v33 = vpack.c.bf16 %v73_v47, %v72_v20  ;;  %v330_v16 = vmul.f32 %v1806_v46, %v2131_v49  ;;  %v95_v20 = vld [vmem:[#allocation5 + $0x330] sm:$0xff]  ;;  %v78_v47 = vld [vmem:[#allocation5 + $0x220] sm:$0xff] }
  0x60   :  { %1520 = vmatmul.mubr.msk.f32.vlgmr.msra.gmra.mrb[0].mxu0 %vm117_vm0, %v327_v63  ;;  %1753 = vmatprep.subr.bf16.mxu1 %v1752_v29  ;;  %v291_v58 = vadd.f32 %v290_v53, %v289_v25  ;;  %v1762_v49 = vpack.c.bf16 %v77_v36, %v76_v22  ;;  %1811 = vrsqrt.f32 %v315_v56  ;;  %v308_v61 = vmul.f32 0.0625, %v284_v57 }
  0x61   :  { %472 = vmatprep.mubr.f32.mxu0 %v2010_v0  ;;  %v297_v12 = vrot.slane %v296_v26, 4  ;;  %v1808_v48 = vpop.eup %1807  ;;  %v1766_v30 = vpack.c.bf16 %v79_v24, %v78_v47  ;;  %v344_v25 = vlaneseq }
  0x62   :  { %v331_v45 = vmul.f32 %v1808_v48, %v2134_v50  ;;  %v292_v62 = vrot.slane %v291_v58, 1  ;;  %v332_v5 = vmul.f32 %v1808_v48, %v2137_v51  ;;  %v316_v8 = vadd.f32 1e-05, %v308_v61 }
  0x63   :  { %1755 = vmatpush3.bf16.msra.mxu1 %v1754_v33  ;;  %v298_v60 = vadd.f32 %v297_v12, %v296_v26 }
  0x64   :  { %1521 = vmatmul.mubr.msk.f32.gmra.mrb[2].mxu0 %vm117_vm0, %v328_v17  ;;  %1757 = vmatprep.subr.bf16.mxu1 %v1756_v40  ;;  %v293_v9 = vadd.f32 %v292_v62, %v291_v58  ;;  %1813 = vrsqrt.f32 %v316_v8 }
  0x65   :  { %478 = vmatprep.mubr.f32.mxu0 %v2010_v0  ;;  %v299_v63 = vrot.slane %v298_v60, 2  ;;  %v1810_v6 = vpop.eup %1809 }
  0x66   :  { %v333_v10 = vmul.f32 %v1810_v6, %v2152_v54  ;;  %v309_v11 = vmul.f32 0.0625, %v293_v9  ;;  %v334_v51 = vmul.f32 %v1810_v6, %v2155_v55 }
  0x67   :  { %1759 = vmatpush3.bf16.msra.mxu1 %v1758_v35  ;;  %v300_v50 = vadd.f32 %v299_v63, %v298_v60 }
  0x68   :  { %1522 = vmatmul.mubr.msk.f32.gmra.mrb[4].mxu0 %vm117_vm0, %v329_v32  ;;  %1761 = vmatprep.subr.bf16.mxu1 %v1760_v21  ;;  %v317_v17 = vadd.f32 1e-05, %v309_v11 }
  0x69   :  { %484 = vmatprep.mubr.f32.mxu0 %v2010_v0  ;;  %v301_v39 = vrot.slane %v300_v50, 1 }
  0x6a   :  { %v1812_v14 = vpop.eup %1811  ;;  %1815 = vrsqrt.f32 %v317_v17 }
  0x6b   :  { %1763 = vmatpush3.bf16.msra.mxu1 %v1762_v49  ;;  %v302_v59 = vadd.f32 %v301_v39, %v300_v50  ;;  %v335_v4 = vmul.f32 %v1812_v14, %v2168_v3  ;;  %v336_v46 = vmul.f32 %v1812_v14, %v2171_v7 }
  0x6c   :  { %1523 = vmatmul.mubr.msk.f32.gmra.mrb[6].mxu0 %vm117_vm0, %v330_v16 }
  0x6d   :  { %490 = vmatprep.mubr.f32.mxu0 %v2010_v0  ;;  %v310_v54 = vmul.f32 0.0625, %v302_v59 }
  0x6e   :  { %v1814_v18 = vpop.eup %1813 }
  0x6f   :  { %v318_v55 = vadd.f32 1e-05, %v310_v54  ;;  %v337_v41 = vmul.f32 %v1814_v18, %v2182_v34  ;;  %v338_v3 = vmul.f32 %v1814_v18, %v2185_v37 }
  0x70   :  { %1524 = vmatmul.mubr.msk.f32.gmra.mrb[8].mxu0 %vm117_vm0, %v331_v45 }
  0x71   :  { %496 = vmatprep.mubr.f32.mxu0 %v2010_v0  ;;  %1817 = vrsqrt.f32 %v318_v55 }
  0x74   :  { %1525 = vmatmul.mubr.msk.f32.gmra.mrb[10].mxu0 %vm117_vm0, %v332_v5  ;;  %v1816_v42 = vpop.eup %1815 }
  0x75   :  { %502 = vmatprep.mubr.f32.mxu0 %v2010_v0  ;;  %v339_v7 = vmul.f32 %v1816_v42, %v2196_v1  ;;  %v340_v34 = vmul.f32 %v1816_v42, %v2199_v2  ;;  %v94_v1 = vld [vmem:[#allocation5 + $0x320] sm:$0xff] }
  0x76   :  { %v1764_v2 = vpack.c.bf16 %v95_v20, %v94_v1 }
  0x78   :  { %1526 = vmatmul.mubr.msk.f32.gmra.mrb[12].mxu0 %vm117_vm0, %v333_v10  ;;  %1765 = vmatprep.subr.bf16.mxu1 %v1764_v2 }
  0x79   :  { %508 = vmatprep.mubr.f32.mxu0 %v2010_v0  ;;  %1767 = vmatpush3.bf16.msra.mxu1 %v1766_v30 }
  0x7b   :  { %v1818_v19 = vpop.eup %1817 }
  0x7c   :  { %1527 = vmatmul.mubr.msk.f32.gmra.mrb[14].mxu0 %vm117_vm0, %v334_v51  ;;  %v341_v37 = vmul.f32 %v1818_v19, %v2209_v23  ;;  %v342_v29 = vmul.f32 %v1818_v19, %v2212_v28  ;;  %v2266_v23 = vshrl.u32 %v344_v25, 7 }
  0x7d   :  { %514 = vmatprep.mubr.f32.mxu0 %v2010_v0 }
  0x7e   :  { %v346_v26 = vsub.s32 0, %v2266_v23 }
  0x80   :  { %1528 = vmatmul.mubr.msk.f32.gmra.mrb[16].mxu0 %vm117_vm0, %v335_v4  ;;  %v2269_v31 = vrot.slane %v98_v27, %v346_v26 }
  0x81   :  { %520 = vmatprep.mubr.f32.mxu0 %v2010_v0 }
  0x84   :  { %1529 = vmatmul.mubr.msk.f32.gmra.mrb[18].mxu0 %vm117_vm0, %v336_v46 }
  0x85   :  { %526 = vmatprep.mubr.f32.mxu0 %v2010_v0 }
  0x88   :  { %1530 = vmatmul.mubr.msk.f32.gmra.mrb[20].mxu0 %vm117_vm0, %v337_v41 }
  0x89   :  { %532 = vmatprep.mubr.f32.mxu0 %v2010_v0 }
  0x8c   :  { %1531 = vmatmul.mubr.msk.f32.gmra.mrb[22].mxu0 %vm117_vm0, %v338_v3 }
  0x8d   :  { %538 = vmatprep.mubr.f32.mxu0 %v2010_v0 }
  0x90   :  { %1532 = vmatmul.mubr.msk.f32.gmra.mrb[24].mxu0 %vm117_vm0, %v339_v7 }
  0x91   :  { %544 = vmatprep.mubr.f32.mxu0 %v2010_v0 }
  0x94   :  { %1533 = vmatmul.mubr.msk.f32.gmra.mrb[26].mxu0 %vm117_vm0, %v340_v34 }
  0x95   :  { %550 = vmatprep.mubr.f32.mxu0 %v2010_v0 }
  0x98   :  { %1534 = vmatmul.mubr.msk.f32.gmra.mrb[28].mxu0 %vm117_vm0, %v341_v37 }
  0x99   :  { %556 = vmatprep.mubr.f32.mxu0 %v2010_v0 }
  0x9c   :  { %1535 = vmatmul.mubr.msk.f32.gmra.mrb[30].mxu0 %vm117_vm0, %v342_v29 }
 0x133   :  { %v468_v28 = vpop.f32.mrb[0].mxu0 }
 0x134   :  { %v469_v32 = vadd.f32 %v468_v28, %v2269_v31  ;;  %v2272_v33 = vpop.f32.mrb[1].mxu0 }
 0x136   :  { %v563_v38 = vmul.f32 %v469_v32, %v469_v32 }
 0x137   :  { %v474_v40 = vpop.f32.mrb[2].mxu0 }
 0x138   :  { %v475_v43 = vadd.f32 %v474_v40, %v2269_v31  ;;  %v2275_v44 = vpop.f32.mrb[3].mxu0  ;;  %643 = vmatprep.mubr.f32.mxu1 %v563_v38 }
 0x139   :  { %644 = vmatmul.mubr.f32.vlgmr.msra.gmra.mrb[0].mxu1 %v469_v32 }
 0x13a   :  { %v564_v52 = vmul.f32 %v475_v43, %v475_v43 }
 0x13b   :  { %v480_v53 = vpop.f32.mrb[4].mxu0 }
 0x13c   :  { %v481_v12 = vadd.f32 %v480_v53, %v2269_v31  ;;  %v2278_v13 = vpop.f32.mrb[5].mxu0  ;;  %648 = vmatprep.mubr.f32.mxu1 %v564_v52 }
 0x13d   :  { %649 = vmatmul.mubr.f32.gmra.mrb[2].mxu1 %v475_v43 }
 0x13e   :  { %v565_v15 = vmul.f32 %v481_v12, %v481_v12 }
 0x13f   :  { %v486_v16 = vpop.f32.mrb[6].mxu0 }
 0x140   :  { %v487_v48 = vadd.f32 %v486_v16, %v2269_v31  ;;  %v2281_v35 = vpop.f32.mrb[7].mxu0  ;;  %653 = vmatprep.mubr.f32.mxu1 %v565_v15 }
 0x141   :  { %654 = vmatmul.mubr.f32.gmra.mrb[4].mxu1 %v481_v12 }
 0x142   :  { %v566_v21 = vmul.f32 %v487_v48, %v487_v48 }
 0x143   :  { %v492_v22 = vpop.f32.mrb[8].mxu0 }
 0x144   :  { %v493_v36 = vadd.f32 %v492_v22, %v2269_v31  ;;  %v2284_v56 = vpop.f32.mrb[9].mxu0  ;;  %658 = vmatprep.mubr.f32.mxu1 %v566_v21 }
 0x145   :  { %659 = vmatmul.mubr.f32.gmra.mrb[6].mxu1 %v487_v48 }
 0x146   :  { %v567_v57 = vmul.f32 %v493_v36, %v493_v36 }
 0x147   :  { %v498_v58 = vpop.f32.mrb[10].mxu0 }
 0x148   :  { %v499_v60 = vadd.f32 %v498_v58, %v2269_v31  ;;  %v2287_v45 = vpop.f32.mrb[11].mxu0  ;;  %663 = vmatprep.mubr.f32.mxu1 %v567_v57 }
 0x149   :  { %664 = vmatmul.mubr.f32.gmra.mrb[8].mxu1 %v493_v36 }
 0x14a   :  { %v568_v49 = vmul.f32 %v499_v60, %v499_v60 }
 0x14b   :  { %v504_v61 = vpop.f32.mrb[12].mxu0 }
 0x14c   :  { %v505_v62 = vadd.f32 %v504_v61, %v2269_v31  ;;  %v2290_v63 = vpop.f32.mrb[13].mxu0  ;;  %668 = vmatprep.mubr.f32.mxu1 %v568_v49 }
 0x14d   :  { %669 = vmatmul.mubr.f32.gmra.mrb[10].mxu1 %v499_v60 }
 0x14e   :  { %v569_v5 = vmul.f32 %v505_v62, %v505_v62 }
 0x14f   :  { %v510_v6 = vpop.f32.mrb[14].mxu0 }
 0x150   :  { %v511_v8 = vadd.f32 %v510_v6, %v2269_v31  ;;  %v2293_v9 = vpop.f32.mrb[15].mxu0  ;;  %673 = vmatprep.mubr.f32.mxu1 %v569_v5 }
 0x151   :  { %674 = vmatmul.mubr.f32.gmra.mrb[12].mxu1 %v505_v62 }
 0x152   :  { %v570_v50 = vmul.f32 %v511_v8, %v511_v8 }
 0x153   :  { %v516_v10 = vpop.f32.mrb[16].mxu0 }
 0x154   :  { %v517_v11 = vadd.f32 %v516_v10, %v2269_v31  ;;  %v2296_v39 = vpop.f32.mrb[17].mxu0  ;;  %678 = vmatprep.mubr.f32.mxu1 %v570_v50 }
 0x155   :  { %679 = vmatmul.mubr.f32.gmra.mrb[14].mxu1 %v511_v8 }
 0x156   :  { %v571_v51 = vmul.f32 %v517_v11, %v517_v11 }
 0x157   :  { %v522_v14 = vpop.f32.mrb[18].mxu0 }
 0x158   :  { %v523_v17 = vadd.f32 %v522_v14, %v2269_v31  ;;  %v2299_v59 = vpop.f32.mrb[19].mxu0  ;;  %683 = vmatprep.mubr.f32.mxu1 %v571_v51 }
 0x159   :  { %684 = vmatmul.mubr.f32.gmra.mrb[16].mxu1 %v517_v11 }
 0x15a   :  { %v572_v4 = vmul.f32 %v523_v17, %v523_v17 }
 0x15b   :  { %v528_v54 = vpop.f32.mrb[20].mxu0 }
 0x15c   :  { %v529_v46 = vadd.f32 %v528_v54, %v2269_v31  ;;  %v2302_v18 = vpop.f32.mrb[21].mxu0  ;;  %688 = vmatprep.mubr.f32.mxu1 %v572_v4 }
 0x15d   :  { %689 = vmatmul.mubr.f32.gmra.mrb[18].mxu1 %v523_v17 }
 0x15e   :  { %v573_v55 = vmul.f32 %v529_v46, %v529_v46 }
 0x15f   :  { %v534_v41 = vpop.f32.mrb[22].mxu0 }
 0x160   :  { %v535_v3 = vadd.f32 %v534_v41, %v2269_v31  ;;  %v2305_v42 = vpop.f32.mrb[23].mxu0  ;;  %693 = vmatprep.mubr.f32.mxu1 %v573_v55 }
 0x161   :  { %694 = vmatmul.mubr.f32.gmra.mrb[20].mxu1 %v529_v46 }
 0x162   :  { %v574_v7 = vmul.f32 %v535_v3, %v535_v3 }
 0x163   :  { %v540_v34 = vpop.f32.mrb[24].mxu0 }
 0x164   :  { %v541_v19 = vadd.f32 %v540_v34, %v2269_v31  ;;  %v2308_v37 = vpop.f32.mrb[25].mxu0  ;;  %698 = vmatprep.mubr.f32.mxu1 %v574_v7 }
 0x165   :  { %699 = vmatmul.mubr.f32.gmra.mrb[22].mxu1 %v535_v3 }
 0x166   :  { %v575_v29 = vmul.f32 %v541_v19, %v541_v19 }
 0x167   :  { %v546_v1 = vpop.f32.mrb[26].mxu0 }
 0x168   :  { %v547_v20 = vadd.f32 %v546_v1, %v2269_v31  ;;  %v2311_v2 = vpop.f32.mrb[27].mxu0  ;;  %703 = vmatprep.mubr.f32.mxu1 %v575_v29 }
 0x169   :  { %704 = vmatmul.mubr.f32.gmra.mrb[24].mxu1 %v541_v19 }
 0x16a   :  { %v576_v47 = vmul.f32 %v547_v20, %v547_v20 }
 0x16b   :  { %v552_v24 = vpop.f32.mrb[28].mxu0 }
 0x16c   :  { %v553_v30 = vadd.f32 %v552_v24, %v2269_v31  ;;  %v2314_v25 = vpop.f32.mrb[29].mxu0  ;;  %708 = vmatprep.mubr.f32.mxu1 %v576_v47 }
 0x16d   :  { %709 = vmatmul.mubr.f32.gmra.mrb[26].mxu1 %v547_v20 }
 0x16e   :  { %v577_v26 = vmul.f32 %v553_v30, %v553_v30 }
 0x16f   :  { %v558_v27 = vpop.f32.mrb[30].mxu0 }
 0x170   :  { %v559_v28 = vadd.f32 %v558_v27, %v2269_v31  ;;  %v2317_v32 = vpop.f32.mrb[31].mxu0  ;;  %713 = vmatprep.mubr.f32.mxu1 %v577_v26 }
 0x171   :  { %714 = vmatmul.mubr.f32.gmra.mrb[28].mxu1 %v553_v30 }
 0x172   :  { %v578_v38 = vmul.f32 %v559_v28, %v559_v28 }
 0x174   :  { %718 = vmatprep.mubr.f32.mxu1 %v578_v38 }
 0x175   :  { %719 = vmatmul.mubr.f32.gmra.mrb[30].mxu1 %v559_v28 }
 0x20c   :  { %v1585_v40 = vpop.f32.mrb[0].mxu1 }
 0x20d   :  { %v1586_v43 = vpop.f32.mrb[1].mxu1 }
 0x20e   :  { %v2319_v52 = vadd.f32 %v1586_v43, %v1585_v40 }
 0x210   :  { %v1588_v53 = vpop.f32.mrb[2].mxu1  ;;  %1819 = vrsqrt.f32 %v2319_v52  ;;  %vm726_vm1 = vcmp.eq.f32.partialorder %v2319_v52, inf  ;;  %v729_v49 = vand.u32 2147483648, %v2319_v52  ;;  %vm728_vm2 = vcmp.eq.f32.partialorder %v2319_v52, 0.0 }
 0x211   :  { %v1589_v12 = vpop.f32.mrb[3].mxu1 }
 0x212   :  { %v2322_v15 = vadd.f32 %v1589_v12, %v1588_v53 }
 0x214   :  { %v1591_v16 = vpop.f32.mrb[4].mxu1  ;;  %1821 = vrsqrt.f32 %v2322_v15  ;;  %vm733_vm3 = vcmp.eq.f32.partialorder %v2322_v15, inf  ;;  %v736_v11 = vand.u32 2147483648, %v2322_v15  ;;  %vm735_vm4 = vcmp.eq.f32.partialorder %v2322_v15, 0.0 }
 0x215   :  { %v1592_v31 = vpop.f32.mrb[5].mxu1 }
 0x216   :  { %v2325_v48 = vadd.f32 %v1592_v31, %v1591_v16 }
 0x218   :  { %v1594_v21 = vpop.f32.mrb[6].mxu1  ;;  %1823 = vrsqrt.f32 %v2325_v48  ;;  %vm740_vm5 = vcmp.eq.f32.partialorder %v2325_v48, inf  ;;  %v743_v41 = vand.u32 2147483648, %v2325_v48  ;;  %vm742_vm6 = vcmp.eq.f32.partialorder %v2325_v48, 0.0 }
 0x219   :  { %v1595_v22 = vpop.f32.mrb[7].mxu1 }
 0x21a   :  { %v1820_v36 = vpop.eup %1819  ;;  %v2328_v57 = vadd.f32 %v1595_v22, %v1594_v21 }
 0x21b   :  { %v725_v58 = vmul.f32 %v1820_v36, %v2319_v52 }
 0x21c   :  { %v1597_v60 = vpop.f32.mrb[8].mxu1  ;;  %1825 = vrsqrt.f32 %v2328_v57  ;;  %vm747_vm7 = vcmp.eq.f32.partialorder %v2328_v57, inf  ;;  %v750_v47 = vand.u32 2147483648, %v2328_v57  ;;  %vm749_vm8 = vcmp.eq.f32.partialorder %v2328_v57, 0.0 }
 0x21d   :  { %v1598_v61 = vpop.f32.mrb[9].mxu1  ;;  %v727_v62 = vsel %vm726_vm1, %v2319_v52, %v725_v58 }
 0x21e   :  { %v1822_v5 = vpop.eup %1821  ;;  %v2336_v6 = vadd.f32 %v1598_v61, %v1597_v60  ;;  %v730_v8 = vsel %vm728_vm2, %v729_v49, %v727_v62 }
 0x21f   :  { %852 = vrot.lane.b32.xlu0 %v730_v8, %s2011_s1  ;;  %v732_v50 = vmul.f32 %v1822_v5, %v2322_v15 }
 0x220   :  { %v1600_v10 = vpop.f32.mrb[10].mxu1  ;;  %1827 = vrsqrt.f32 %v2336_v6  ;;  %vm754_vm9 = vcmp.eq.f32.partialorder %v2336_v6, inf  ;;  %v757_v43 = vand.u32 2147483648, %v2336_v6  ;;  %vm756_vm10 = vcmp.eq.f32.partialorder %v2336_v6, 0.0 }
 0x221   :  { %v1601_v51 = vpop.f32.mrb[11].mxu1  ;;  %v734_v14 = vsel %vm733_vm3, %v2322_v15, %v732_v50 }
 0x222   :  { %v1824_v17 = vpop.eup %1823  ;;  %v2345_v4 = vadd.f32 %v1601_v51, %v1600_v10  ;;  %v737_v54 = vsel %vm735_vm4, %v736_v11, %v734_v14 }
 0x223   :  { %854 = vrot.lane.b32.xlu0 %v737_v54, %s2011_s1  ;;  %v739_v46 = vmul.f32 %v1824_v17, %v2325_v48 }
 0x224   :  { %v1603_v55 = vpop.f32.mrb[12].mxu1  ;;  %1829 = vrsqrt.f32 %v2345_v4  ;;  %vm761_vm11 = vcmp.eq.f32.partialorder %v2345_v4, inf  ;;  %v764_v58 = vand.u32 2147483648, %v2345_v4  ;;  %vm763_vm12 = vcmp.eq.f32.partialorder %v2345_v4, 0.0 }
 0x225   :  { %v1604_v3 = vpop.f32.mrb[13].mxu1  ;;  %v741_v7 = vsel %vm740_vm5, %v2325_v48, %v739_v46 }
 0x226   :  { %v1826_v34 = vpop.eup %1825  ;;  %v2354_v19 = vadd.f32 %v1604_v3, %v1603_v55  ;;  %v744_v29 = vsel %vm742_vm6, %v743_v41, %v741_v7 }
 0x227   :  { %856 = vrot.lane.b32.xlu1 %v744_v29, %s2011_s1  ;;  %v746_v1 = vmul.f32 %v1826_v34, %v2328_v57 }
 0x228   :  { %v1606_v20 = vpop.f32.mrb[14].mxu1  ;;  %1831 = vrsqrt.f32 %v2354_v19  ;;  %vm768_vm13 = vcmp.eq.f32.partialorder %v2354_v19, inf  ;;  %v771_v10 = vand.u32 2147483648, %v2354_v19  ;;  %vm770_vm14 = vcmp.eq.f32.partialorder %v2354_v19, 0.0 }
 0x229   :  { %v1607_v24 = vpop.f32.mrb[15].mxu1  ;;  %v748_v30 = vsel %vm747_vm7, %v2328_v57, %v746_v1  ;;  %vm1189_vm7 = vcmask 1043456  }
 0x22a   :  { %v1828_v26 = vpop.eup %1827  ;;  %v2363_v27 = vadd.f32 %v1607_v24, %v1606_v20  ;;  %v751_v28 = vsel %vm749_vm8, %v750_v47, %v748_v30 }
 0x22b   :  { %858 = vrot.lane.b32.xlu1 %v751_v28, %s2011_s1  ;;  %v753_v38 = vmul.f32 %v1828_v26, %v2336_v6 }
 0x22c   :  { %v1609_v40 = vpop.f32.mrb[16].mxu1  ;;  %1833 = vrsqrt.f32 %v2363_v27  ;;  %vm775_vm15 = vcmp.eq.f32.partialorder %v2363_v27, inf  ;;  %v778_v41 = vand.u32 2147483648, %v2363_v27  ;;  %vm777_vm0 = vcmp.eq.f32.partialorder %v2363_v27, 0.0 }
 0x22d   :  { %v1610_v53 = vpop.f32.mrb[17].mxu1  ;;  %v755_v12 = vsel %vm754_vm9, %v2336_v6, %v753_v38 }
 0x22e   :  { %v1830_v16 = vpop.eup %1829  ;;  %v2372_v31 = vadd.f32 %v1610_v53, %v1609_v40  ;;  %v758_v21 = vsel %vm756_vm10, %v757_v43, %v755_v12 }
 0x22f   :  { %860 = vrot.lane.b32.xlu0 %v758_v21, %s2011_s1  ;;  %v760_v22 = vmul.f32 %v1830_v16, %v2345_v4 }
 0x230   :  { %v1612_v36 = vpop.f32.mrb[18].mxu1  ;;  %1835 = vrsqrt.f32 %v2372_v31  ;;  %vm782_vm1 = vcmp.eq.f32.partialorder %v2372_v31, inf  ;;  %v785_v24 = vand.u32 2147483648, %v2372_v31  ;;  %vm784_vm2 = vcmp.eq.f32.partialorder %v2372_v31, 0.0 }
 0x231   :  { %v1613_v60 = vpop.f32.mrb[19].mxu1  ;;  %v762_v49 = vsel %vm761_vm11, %v2345_v4, %v760_v22 }
 0x232   :  { %v1832_v61 = vpop.eup %1831  ;;  %v2381_v62 = vadd.f32 %v1613_v60, %v1612_v36  ;;  %v765_v5 = vsel %vm763_vm12, %v764_v58, %v762_v49 }
 0x233   :  { %862 = vrot.lane.b32.xlu1 %v765_v5, %s2011_s1  ;;  %v767_v8 = vmul.f32 %v1832_v61, %v2354_v19  ;;  %v96_v5 = vld [vmem:[#allocation5 + $0x340] sm:$0xf] }
 0x234   :  { %v1615_v50 = vpop.f32.mrb[20].mxu1  ;;  %1837 = vrsqrt.f32 %v2381_v62  ;;  %vm789_vm3 = vcmp.eq.f32.partialorder %v2381_v62, inf  ;;  %v792_v12 = vand.u32 2147483648, %v2381_v62  ;;  %vm791_vm4 = vcmp.eq.f32.partialorder %v2381_v62, 0.0  ;;  %1667 = vmatprep.subr.msk.mxu0 %vm1189_vm7, %v96_v5 }
 0x235   :  { %v1616_v11 = vpop.f32.mrb[21].mxu1  ;;  %v769_v51 = vsel %vm768_vm13, %v2354_v19, %v767_v8  ;;  %1668 = vmatpush3.msk.msra.mxu0 %vm1189_vm7, %v96_v5  ;;  %vm1044_vm7 = vcmask 31744  }
 0x236   :  { %v1834_v14 = vpop.eup %1833  ;;  %v2390_v17 = vadd.f32 %v1616_v11, %v1615_v50  ;;  %v772_v54 = vsel %vm770_vm14, %v771_v10, %v769_v51 }
 0x237   :  { %864 = vrot.lane.b32.xlu0 %v772_v54, %s2011_s1  ;;  %v774_v46 = vmul.f32 %v1834_v14, %v2363_v27 }
 0x238   :  { %v1618_v55 = vpop.f32.mrb[22].mxu1  ;;  %1839 = vrsqrt.f32 %v2390_v17  ;;  %vm796_vm5 = vcmp.eq.f32.partialorder %v2390_v17, inf  ;;  %v799_v61 = vand.u32 2147483648, %v2390_v17  ;;  %vm798_vm6 = vcmp.eq.f32.partialorder %v2390_v17, 0.0 }
 0x239   :  { %v1619_v3 = vpop.f32.mrb[23].mxu1  ;;  %v776_v7 = vsel %vm775_vm15, %v2363_v27, %v774_v46 }
 0x23a   :  { %v1836_v34 = vpop.eup %1835  ;;  %v2399_v29 = vadd.f32 %v1619_v3, %v1618_v55  ;;  %v779_v1 = vsel %vm777_vm0, %v778_v41, %v776_v7 }
 0x23b   :  { %866 = vrot.lane.b32.xlu1 %v779_v1, %s2011_s1  ;;  %v781_v20 = vmul.f32 %v1836_v34, %v2372_v31 }
 0x23c   :  { %v1621_v47 = vpop.f32.mrb[24].mxu1  ;;  %1841 = vrsqrt.f32 %v2399_v29  ;;  %vm803_vm8 = vcmp.eq.f32.partialorder %v2399_v29, inf  ;;  %v806_v46 = vand.u32 2147483648, %v2399_v29  ;;  %vm805_vm9 = vcmp.eq.f32.partialorder %v2399_v29, 0.0 }
 0x23d   :  { %v1622_v30 = vpop.f32.mrb[25].mxu1  ;;  %v783_v26 = vsel %vm782_vm1, %v2372_v31, %v781_v20 }
 0x23e   :  { %v1838_v28 = vpop.eup %1837  ;;  %v2408_v38 = vadd.f32 %v1622_v30, %v1621_v47  ;;  %v786_v40 = vsel %vm784_vm2, %v785_v24, %v783_v26 }
 0x23f   :  { %868 = vrot.lane.b32.xlu0 %v786_v40, %s2011_s1  ;;  %v788_v43 = vmul.f32 %v1838_v28, %v2381_v62 }
 0x240   :  { %v1624_v53 = vpop.f32.mrb[26].mxu1  ;;  %1843 = vrsqrt.f32 %v2408_v38  ;;  %vm810_vm10 = vcmp.eq.f32.partialorder %v2408_v38, inf  ;;  %v813_v20 = vand.u32 2147483648, %v2408_v38  ;;  %vm812_vm11 = vcmp.eq.f32.partialorder %v2408_v38, 0.0 }
 0x241   :  { %v1625_v16 = vpop.f32.mrb[27].mxu1  ;;  %v790_v21 = vsel %vm789_vm3, %v2381_v62, %v788_v43 }
 0x242   :  { %v1840_v22 = vpop.eup %1839  ;;  %v2417_v36 = vadd.f32 %v1625_v16, %v1624_v53  ;;  %v793_v58 = vsel %vm791_vm4, %v792_v12, %v790_v21 }
 0x243   :  { %870 = vrot.lane.b32.xlu1 %v793_v58, %s2011_s1  ;;  %v795_v60 = vmul.f32 %v1840_v22, %v2390_v17 }
 0x244   :  { %v1627_v49 = vpop.f32.mrb[28].mxu1  ;;  %1845 = vrsqrt.f32 %v2417_v36  ;;  %vm817_vm12 = vcmp.eq.f32.partialorder %v2417_v36, inf  ;;  %v820_v28 = vand.u32 2147483648, %v2417_v36  ;;  %vm819_vm13 = vcmp.eq.f32.partialorder %v2417_v36, 0.0 }
 0x245   :  { %v1628_v8 = vpop.f32.mrb[29].mxu1  ;;  %v797_v50 = vsel %vm796_vm5, %v2390_v17, %v795_v60 }
 0x246   :  { %v1842_v10 = vpop.eup %1841  ;;  %v2426_v11 = vadd.f32 %v1628_v8, %v1627_v49  ;;  %v800_v51 = vsel %vm798_vm6, %v799_v61, %v797_v50  ;;  %v2463_v8 = vld [vmem:[#allocation5 + $0x346] ss:$0 sm:$0xff] }
 0x247   :  { %872 = vrot.lane.b32.xlu0 %v800_v51, %s2011_s1  ;;  %v802_v14 = vmul.f32 %v1842_v10, %v2399_v29 }
 0x248   :  { %v1630_v54 = vpop.f32.mrb[30].mxu1  ;;  %1847 = vrsqrt.f32 %v2426_v11  ;;  %vm824_vm14 = vcmp.eq.f32.partialorder %v2426_v11, inf  ;;  %v827_v16 = vand.u32 2147483648, %v2426_v11  ;;  %vm826_vm15 = vcmp.eq.f32.partialorder %v2426_v11, 0.0 }
 0x249   :  { %v1631_v55 = vpop.f32.mrb[31].mxu1  ;;  %v804_v41 = vsel %vm803_vm8, %v2399_v29, %v802_v14 }
 0x24a   :  { %v1844_v3 = vpop.eup %1843  ;;  %v2435_v7 = vadd.f32 %v1631_v55, %v1630_v54  ;;  %v807_v34 = vsel %vm805_vm9, %v806_v46, %v804_v41 }
 0x24b   :  { %874 = vrot.lane.b32.xlu1 %v807_v34, %s2011_s1  ;;  %v809_v1 = vmul.f32 %v1844_v3, %v2408_v38 }
 0x24c   :  { %1849 = vrsqrt.f32 %v2435_v7  ;;  %vm831_vm0 = vcmp.eq.f32.partialorder %v2435_v7, inf  ;;  %v834_v49 = vand.u32 2147483648, %v2435_v7  ;;  %vm833_vm1 = vcmp.eq.f32.partialorder %v2435_v7, 0.0 }
 0x24d   :  { %v811_v47 = vsel %vm810_vm10, %v2408_v38, %v809_v1 }
 0x24e   :  { %v1846_v24 = vpop.eup %1845  ;;  %v814_v30 = vsel %vm812_vm11, %v813_v20, %v811_v47 }
 0x24f   :  { %876 = vrot.lane.b32.xlu0 %v814_v30, %s2011_s1  ;;  %v816_v26 = vmul.f32 %v1846_v24, %v2417_v36 }
 0x251   :  { %v818_v40 = vsel %vm817_vm12, %v2417_v36, %v816_v26 }
 0x252   :  { %v1848_v43 = vpop.eup %1847  ;;  %v821_v53 = vsel %vm819_vm13, %v820_v28, %v818_v40 }
 0x253   :  { %878 = vrot.lane.b32.xlu1 %v821_v53, %s2011_s1  ;;  %v823_v12 = vmul.f32 %v1848_v43, %v2426_v11 }
 0x255   :  { %v825_v21 = vsel %vm824_vm14, %v2426_v11, %v823_v12 }
 0x256   :  { %v1850_v22 = vpop.eup %1849  ;;  %v828_v58 = vsel %vm826_vm15, %v827_v16, %v825_v21 }
 0x257   :  { %880 = vrot.lane.b32.xlu0 %v828_v58, %s2011_s1  ;;  %v830_v60 = vmul.f32 %v1850_v22, %v2435_v7 }
 0x259   :  { %v832_v61 = vsel %vm831_vm0, %v2435_v7, %v830_v60 }
 0x25a   :  { %v835_v5 = vsel %vm833_vm1, %v834_v49, %v832_v61 }
 0x25b   :  { %882 = vrot.lane.b32.xlu1 %v835_v5, %s2011_s1 }
 0x291   :  { %v853_v50 = vpop.permute.xlu0 %852 }
 0x292   :  { %v900_v10 = vmul.f32 %v853_v50, %v2463_v8 }
 0x294   :  { %v916_v51 = vmax.f32 %v900_v10, 1.1920929e-07 }
 0x295   :  { %v855_v14 = vpop.permute.xlu0 %854 }
 0x296   :  { %1851 = vrcp.f32 %v916_v51  ;;  %v901_v54 = vmul.f32 %v855_v14, %v2463_v8 }
 0x298   :  { %v917_v46 = vmax.f32 %v901_v54, 1.1920929e-07 }
 0x299   :  { %v857_v55 = vpop.permute.xlu1 %856 }
 0x29a   :  { %1853 = vrcp.f32 %v917_v46  ;;  %v902_v41 = vmul.f32 %v857_v55, %v2463_v8 }
 0x29c   :  { %v918_v3 = vmax.f32 %v902_v41, 1.1920929e-07 }
 0x29d   :  { %v859_v34 = vpop.permute.xlu1 %858 }
 0x29e   :  { %1855 = vrcp.f32 %v918_v3  ;;  %v903_v1 = vmul.f32 %v859_v34, %v2463_v8 }
 0x2a0   :  { %v1852_v20 = vpop.eup %1851  ;;  %v919_v47 = vmax.f32 %v903_v1, 1.1920929e-07 }
 0x2a1   :  { %v948_v24 = vmul.f32 %v1852_v20, %v2319_v52  ;;  %v861_v30 = vpop.permute.xlu0 %860 }
 0x2a2   :  { %1857 = vrcp.f32 %v919_v47  ;;  %v904_v26 = vmul.f32 %v861_v30, %v2463_v8 }
 0x2a3   :  { %vm964_vm2 = vcmp.gt.f32.partialorder %v948_v24, 0.0  ;;  %v980_v28 = vmul.f32 0.01, %v948_v24 }
 0x2a4   :  { %v1854_v40 = vpop.eup %1853  ;;  %v920_v43 = vmax.f32 %v904_v26, 1.1920929e-07 }
 0x2a5   :  { %v996_v53 = vsel %vm964_vm2, %v948_v24, %v980_v28  ;;  %v949_v12 = vmul.f32 %v1854_v40, %v2322_v15  ;;  %v863_v16 = vpop.permute.xlu1 %862 }
 0x2a6   :  { %v1012_v21 = vmul.f32 1.442695, %v996_v53  ;;  %1859 = vrcp.f32 %v920_v43  ;;  %v905_v22 = vmul.f32 %v863_v16, %v2463_v8 }
 0x2a7   :  { %vm965_vm3 = vcmp.gt.f32.partialorder %v949_v12, 0.0  ;;  %v981_v58 = vmul.f32 0.01, %v949_v12 }
 0x2a8   :  { %v1856_v60 = vpop.eup %1855  ;;  %v921_v52 = vmax.f32 %v905_v22, 1.1920929e-07  ;;  %1861 = vpow2.f32 %v1012_v21 }
 0x2a9   :  { %v997_v49 = vsel %vm965_vm3, %v949_v12, %v981_v58  ;;  %v950_v61 = vmul.f32 %v1856_v60, %v2325_v48  ;;  %v865_v5 = vpop.permute.xlu0 %864  ;;  %vm2013_vm3 = vmmov 0  }
 0x2aa   :  { %v1014_v50 = vmul.f32 1.442695, %v997_v49  ;;  %1863 = vrcp.f32 %v921_v52  ;;  %v906_v10 = vmul.f32 %v865_v5, %v2463_v8  ;;  %1725 = vmatprep.mubr.msk.f32.mxu1 %vm2013_vm3, %v2010_v0 }
 0x2ab   :  { %vm966_vm4 = vcmp.gt.f32.partialorder %v950_v61, 0.0  ;;  %v982_v15 = vmul.f32 0.01, %v950_v61 }
 0x2ac   :  { %v1858_v51 = vpop.eup %1857  ;;  %1865 = vpow2.f32 %v1014_v50  ;;  %v922_v14 = vmax.f32 %v906_v10, 1.1920929e-07 }
 0x2ad   :  { %v998_v54 = vsel %vm966_vm4, %v950_v61, %v982_v15  ;;  %v951_v46 = vmul.f32 %v1858_v51, %v2328_v57  ;;  %v867_v55 = vpop.permute.xlu1 %866  ;;  %vm1418_vm4 = vcmask 1041409  }
 0x2ae   :  { %v1016_v41 = vmul.f32 1.442695, %v998_v54  ;;  %1867 = vrcp.f32 %v922_v14  ;;  %v907_v3 = vmul.f32 %v867_v55, %v2463_v8 }
 0x2af   :  { %vm967_vm5 = vcmp.gt.f32.partialorder %v951_v46, 0.0  ;;  %v983_v48 = vmul.f32 0.01, %v951_v46 }
 0x2b0   :  { %v1860_v34 = vpop.eup %1859  ;;  %v923_v1 = vmax.f32 %v907_v3, 1.1920929e-07  ;;  %1869 = vpow2.f32 %v1016_v41 }
 0x2b1   :  { %v999_v20 = vsel %vm967_vm5, %v951_v46, %v983_v48  ;;  %v952_v47 = vmul.f32 %v1860_v34, %v2336_v6  ;;  %v869_v24 = vpop.permute.xlu0 %868  ;;  %vm1420_vm5 = vcmask 1042434  }
 0x2b2   :  { %v1018_v30 = vmul.f32 1.442695, %v999_v20  ;;  %1871 = vrcp.f32 %v923_v1  ;;  %v908_v26 = vmul.f32 %v869_v24, %v2463_v8  ;;  %v2479_v28 = vpop.eup %1861 }
 0x2b3   :  { %vm968_vm6 = vcmp.gt.f32.partialorder %v952_v47, 0.0  ;;  %v984_v57 = vmul.f32 0.01, %v952_v47  ;;  %v1045_v22 = vsel %vm1044_vm7, %v2479_v28, 0.0 }
 0x2b4   :  { %v1864_v40 = vpop.eup %1863  ;;  %1873 = vpow2.f32 %v1018_v30  ;;  %v924_v43 = vmax.f32 %v908_v26, 1.1920929e-07 }
 0x2b5   :  { %v1000_v53 = vsel %vm968_vm6, %v952_v47, %v984_v57  ;;  %v953_v12 = vmul.f32 %v1864_v40, %v2345_v4  ;;  %v871_v16 = vpop.permute.xlu1 %870  ;;  %vm1422_vm6 = vcmask 1043459  }
 0x2b6   :  { %v2482_v21 = vpop.eup %1865  ;;  %1875 = vrcp.f32 %v924_v43  ;;  %v909_v6 = vmul.f32 %v871_v16, %v2463_v8  ;;  %v1020_v58 = vmul.f32 1.442695, %v1000_v53 }
 0x2b7   :  { %vm969_vm8 = vcmp.gt.f32.partialorder %v953_v12, 0.0  ;;  %v985_v60 = vmul.f32 0.01, %v953_v12  ;;  %v1046_v52 = vsel %vm1044_vm7, %v2482_v21, 0.0 }
 0x2b8   :  { %v1868_v49 = vpop.eup %1867  ;;  %v925_v61 = vmax.f32 %v909_v6, 1.1920929e-07  ;;  %v1047_v5 = vadd.f32 %v1046_v52, %v1045_v22 }
 0x2b9   :  { %v1001_v50 = vsel %vm969_vm8, %v953_v12, %v985_v60  ;;  %v954_v4 = vmul.f32 %v1868_v49, %v2354_v19  ;;  %v873_v10 = vpop.permute.xlu0 %872  ;;  %vm1426_vm8 = vcmask 1045509  }
 0x2ba   :  { %v1022_v15 = vmul.f32 1.442695, %v1001_v50  ;;  %1877 = vrcp.f32 %v925_v61  ;;  %v910_v51 = vmul.f32 %v873_v10, %v2463_v8  ;;  %v1048_v14 = vrot.slane %v1047_v5, 4  ;;  %v2491_v54 = vpop.eup %1869 }
 0x2bb   :  { %1879 = vpow2.f32 %v1020_v58  ;;  %vm970_vm9 = vcmp.gt.f32.partialorder %v954_v4, 0.0  ;;  %v986_v46 = vmul.f32 0.01, %v954_v4  ;;  %v1054_v24 = vsel %vm1044_vm7, %v2491_v54, 0.0 }
 0x2bc   :  { %v1872_v55 = vpop.eup %1871  ;;  %1881 = vpow2.f32 %v1022_v15  ;;  %v926_v41 = vmax.f32 %v910_v51, 1.1920929e-07  ;;  %v1049_v3 = vadd.f32 %v1048_v14, %v1047_v5 }
 0x2bd   :  { %v1002_v48 = vsel %vm970_vm9, %v954_v4, %v986_v46  ;;  %v955_v34 = vmul.f32 %v1872_v55, %v2363_v27  ;;  %v875_v1 = vpop.permute.xlu1 %874  ;;  %vm1428_vm9 = vcmask 1046534  }
 0x2be   :  { %v2494_v19 = vpop.eup %1873  ;;  %1883 = vrcp.f32 %v926_v41  ;;  %v911_v20 = vmul.f32 %v875_v1, %v2463_v8  ;;  %v1050_v47 = vrot.slane %v1049_v3, 2  ;;  %v1024_v30 = vmul.f32 1.442695, %v1002_v48 }
 0x2bf   :  { %vm971_vm10 = vcmp.gt.f32.partialorder %v955_v34, 0.0  ;;  %v987_v26 = vmul.f32 0.01, %v955_v34  ;;  %v1055_v57 = vsel %vm1044_vm7, %v2494_v19, 0.0 }
 0x2c0   :  { %v1876_v40 = vpop.eup %1875  ;;  %v927_v43 = vmax.f32 %v911_v20, 1.1920929e-07  ;;  %v1051_v53 = vadd.f32 %v1050_v47, %v1049_v3  ;;  %v1056_v27 = vadd.f32 %v1055_v57, %v1054_v24 }
 0x2c1   :  { %v1003_v12 = vsel %vm971_vm10, %v955_v34, %v987_v26  ;;  %v956_v16 = vmul.f32 %v1876_v40, %v2372_v31  ;;  %v877_v6 = vpop.permute.xlu0 %876  ;;  %vm1430_vm10 = vcmask 1047559  }
 0x2c2   :  { %v1026_v22 = vmul.f32 1.442695, %v1003_v12  ;;  %1885 = vrcp.f32 %v927_v43  ;;  %v912_v58 = vmul.f32 %v877_v6, %v2463_v8  ;;  %v1052_v60 = vrot.slane %v1051_v53, 1 }
 0x2c3   :  { %1887 = vpow2.f32 %v1024_v30  ;;  %vm972_vm11 = vcmp.gt.f32.partialorder %v956_v16, 0.0  ;;  %v988_v52 = vmul.f32 0.01, %v956_v16  ;;  %v1057_v49 = vrot.slane %v1056_v27, 4 }
 0x2c4   :  { %v1878_v61 = vpop.eup %1877  ;;  %1889 = vpow2.f32 %v1026_v22  ;;  %v928_v5 = vmax.f32 %v912_v58, 1.1920929e-07  ;;  %v1053_v50 = vadd.f32 %v1052_v60, %v1051_v53 }
 0x2c5   :  { %v2503_v4 = vpop.eup %1879  ;;  %v1004_v10 = vsel %vm972_vm11, %v956_v16, %v988_v52  ;;  %v957_v15 = vmul.f32 %v1878_v61, %v2381_v62  ;;  %v879_v31 = vpop.permute.xlu1 %878  ;;  %v1058_v51 = vadd.f32 %v1057_v49, %v1056_v27 }
 0x2c6   :  { %v2506_v14 = vpop.eup %1881  ;;  %v1028_v46 = vmul.f32 1.442695, %v1004_v10  ;;  %1891 = vrcp.f32 %v928_v5  ;;  %v913_v55 = vmul.f32 %v879_v31, %v2463_v8  ;;  %v1063_v1 = vsel %vm1044_vm7, %v2503_v4, 0.0 }
 0x2c7   :  { %vm973_vm12 = vcmp.gt.f32.partialorder %v957_v15, 0.0  ;;  %v989_v41 = vmul.f32 0.01, %v957_v15  ;;  %1893 = vrcp.f32 %v1053_v50  ;;  %v1059_v3 = vrot.slane %v1058_v51, 2 }
 0x2c8   :  { %v1884_v48 = vpop.eup %1883  ;;  %1895 = vpow2.f32 %v1028_v46  ;;  %v929_v34 = vmax.f32 %v913_v55, 1.1920929e-07  ;;  %v1064_v62 = vsel %vm1044_vm7, %v2506_v14, 0.0 }
 0x2c9   :  { %v1005_v20 = vsel %vm973_vm12, %v957_v15, %v989_v41  ;;  %v958_v47 = vmul.f32 %v1884_v48, %v2390_v17  ;;  %v881_v24 = vpop.permute.xlu0 %880  ;;  %v1060_v30 = vadd.f32 %v1059_v3, %v1058_v51  ;;  %v1065_v26 = vadd.f32 %v1064_v62, %v1063_v1 }
 0x2ca   :  { %v1030_v57 = vmul.f32 1.442695, %v1005_v20  ;;  %1897 = vrcp.f32 %v929_v34  ;;  %v914_v40 = vmul.f32 %v881_v24, %v2463_v8 }
 0x2cb   :  { %vm974_vm13 = vcmp.gt.f32.partialorder %v958_v47, 0.0  ;;  %v990_v43 = vmul.f32 0.01, %v958_v47  ;;  %v1061_v53 = vrot.slane %v1060_v30, 1  ;;  %v1066_v27 = vrot.slane %v1065_v26, 4 }
 0x2cc   :  { %v1886_v12 = vpop.eup %1885  ;;  %1899 = vpow2.f32 %v1030_v57  ;;  %v930_v16 = vmax.f32 %v914_v40, 1.1920929e-07 }
 0x2cd   :  { %v2515_v6 = vpop.eup %1887  ;;  %v1006_v22 = vsel %vm974_vm13, %v958_v47, %v990_v43  ;;  %v959_v58 = vmul.f32 %v1886_v12, %v2399_v29  ;;  %v883_v17 = vpop.permute.xlu1 %882  ;;  %v1062_v60 = vadd.f32 %v1061_v53, %v1060_v30  ;;  %v1067_v52 = vadd.f32 %v1066_v27, %v1065_v26 }
 0x2ce   :  { %v2518_v49 = vpop.eup %1889  ;;  %v1032_v61 = vmul.f32 1.442695, %v1006_v22  ;;  %1901 = vrcp.f32 %v930_v16  ;;  %v915_v5 = vmul.f32 %v883_v17, %v2463_v8  ;;  %v1072_v51 = vsel %vm1044_vm7, %v2515_v6, 0.0 }
 0x2cf   :  { %vm975_vm14 = vcmp.gt.f32.partialorder %v959_v58, 0.0  ;;  %v991_v50 = vmul.f32 0.01, %v959_v58  ;;  %1903 = vrcp.f32 %v1062_v60  ;;  %v1068_v10 = vrot.slane %v1067_v52, 2 }
 0x2d0   :  { %v1892_v15 = vpop.eup %1891  ;;  %1905 = vpow2.f32 %v1032_v61  ;;  %v931_v31 = vmax.f32 %v915_v5, 1.1920929e-07  ;;  %v1073_v29 = vsel %vm1044_vm7, %v2518_v49, 0.0 }
 0x2d1   :  { %v1894_v46 = vpop.eup %1893  ;;  %v1007_v55 = vsel %vm975_vm14, %v959_v58, %v991_v50  ;;  %v960_v41 = vmul.f32 %v1892_v15, %v2408_v38  ;;  %v1069_v3 = vadd.f32 %v1068_v10, %v1067_v52  ;;  %v1074_v48 = vadd.f32 %v1073_v29, %v1072_v51 }
 0x2d2   :  { %v2526_v8 = vpop.eup %1895  ;;  %v1034_v34 = vmul.f32 1.442695, %v1007_v55  ;;  %1907 = vrcp.f32 %v931_v31  ;;  %v1118_v1 = vmul.f32 %v1894_v46, %v2479_v28  ;;  %v1119_v62 = vmul.f32 %v1894_v46, %v2482_v21 }
 0x2d3   :  { %vm976_vm15 = vcmp.gt.f32.partialorder %v960_v41, 0.0  ;;  %v992_v20 = vmul.f32 0.01, %v960_v41  ;;  %v1070_v47 = vrot.slane %v1069_v3, 1  ;;  %v1075_v24 = vrot.slane %v1074_v48, 4 }
 0x2d4   :  { %v1898_v30 = vpop.eup %1897  ;;  %1909 = vpow2.f32 %v1034_v34  ;;  %1669 = vmatprep.mubr.msk.f32.mxu0 %vm1044_vm7, %v1118_v1  ;;  %v1081_v12 = vsel %vm1044_vm7, %v2526_v8, 0.0 }
 0x2d5   :  { %v1008_v26 = vsel %vm976_vm15, %v960_v41, %v992_v20  ;;  %v961_v38 = vmul.f32 %v1898_v30, %v2417_v36  ;;  %1670 = vmatmul.mubr.msk.f32.vlgmr.msra.gmra.mrb[32].mxu0 %vm1044_vm7, %v1119_v62  ;;  %v1071_v57 = vadd.f32 %v1070_v47, %v1069_v3  ;;  %v1076_v40 = vadd.f32 %v1075_v24, %v1074_v48 }
 0x2d6   :  { %v2533_v43 = vpop.eup %1899  ;;  %v1036_v28 = vmul.f32 1.442695, %v1008_v26 }
 0x2d7   :  { %vm977_vm0 = vcmp.gt.f32.partialorder %v961_v38, 0.0  ;;  %v993_v21 = vmul.f32 0.01, %v961_v38  ;;  %1911 = vrcp.f32 %v1071_v57  ;;  %v1077_v53 = vrot.slane %v1076_v40, 2 }
 0x2d8   :  { %v1902_v27 = vpop.eup %1901  ;;  %v1082_v16 = vsel %vm1044_vm7, %v2533_v43, 0.0  ;;  %1913 = vpow2.f32 %v1036_v28 }
 0x2d9   :  { %v1904_v22 = vpop.eup %1903  ;;  %v1009_v36 = vsel %vm977_vm0, %v961_v38, %v993_v21  ;;  %v962_v58 = vmul.f32 %v1902_v27, %v2426_v11  ;;  %v1078_v17 = vadd.f32 %v1077_v53, %v1076_v40  ;;  %v1083_v60 = vadd.f32 %v1082_v16, %v1081_v12 }
 0x2da   :  { %v2540_v52 = vpop.eup %1905  ;;  %v1038_v61 = vmul.f32 1.442695, %v1009_v36  ;;  %v1121_v5 = vmul.f32 %v1904_v22, %v2491_v54  ;;  %v1122_v50 = vmul.f32 %v1904_v22, %v2494_v19 }
 0x2db   :  { %vm978_vm1 = vcmp.gt.f32.partialorder %v962_v58, 0.0  ;;  %v994_v10 = vmul.f32 0.01, %v962_v58  ;;  %v1079_v15 = vrot.slane %v1078_v17, 1  ;;  %v1084_v31 = vrot.slane %v1083_v60, 4 }
 0x2dc   :  { %v1908_v51 = vpop.eup %1907  ;;  %1915 = vpow2.f32 %v1038_v61  ;;  %1672 = vmatprep.mubr.msk.f32.mxu0 %vm1044_vm7, %v1121_v5  ;;  %v1090_v48 = vsel %vm1044_vm7, %v2540_v52, 0.0 }
 0x2dd   :  { %v1010_v29 = vsel %vm978_vm1, %v962_v58, %v994_v10  ;;  %v963_v11 = vmul.f32 %v1908_v51, %v2435_v7  ;;  %1673 = vmatmul.mubr.msk.f32.gmra.mrb[34].mxu0 %vm1044_vm7, %v1122_v50  ;;  %v1080_v46 = vadd.f32 %v1079_v15, %v1078_v17  ;;  %v1085_v55 = vadd.f32 %v1084_v31, %v1083_v60 }
 0x2de   :  { %v1910_v41 = vpop.eup %1909  ;;  %v1040_v3 = vmul.f32 1.442695, %v1010_v29 }
 0x2df   :  { %vm979_vm2 = vcmp.gt.f32.partialorder %v963_v11, 0.0  ;;  %v995_v54 = vmul.f32 0.01, %v963_v11  ;;  %1917 = vrcp.f32 %v1080_v46  ;;  %v1086_v19 = vrot.slane %v1085_v55, 2 }
 0x2e0   :  { %v1091_v34 = vsel %vm1044_vm7, %v1910_v41, 0.0  ;;  %1919 = vpow2.f32 %v1040_v3 }
 0x2e1   :  { %v1912_v1 = vpop.eup %1911  ;;  %v1011_v62 = vsel %vm979_vm2, %v963_v11, %v995_v54  ;;  %v1087_v20 = vadd.f32 %v1086_v19, %v1085_v55  ;;  %v1092_v47 = vadd.f32 %v1091_v34, %v1090_v48 }
 0x2e2   :  { %v1042_v7 = vmul.f32 1.442695, %v1011_v62  ;;  %v1124_v24 = vmul.f32 %v1912_v1, %v2503_v4  ;;  %v1125_v30 = vmul.f32 %v1912_v1, %v2506_v14  ;;  %v1914_v57 = vpop.eup %1913 }
 0x2e3   :  { %v1088_v26 = vrot.slane %v1087_v20, 1  ;;  %v1093_v38 = vrot.slane %v1092_v47, 4  ;;  %v1099_v27 = vsel %vm1044_vm7, %v1914_v57, 0.0 }
 0x2e4   :  { %1921 = vpow2.f32 %v1042_v7  ;;  %1675 = vmatprep.mubr.msk.f32.mxu0 %vm1044_vm7, %v1124_v24 }
 0x2e5   :  { %1676 = vmatmul.mubr.msk.f32.gmra.mrb[36].mxu0 %vm1044_vm7, %v1125_v30  ;;  %v1089_v40 = vadd.f32 %v1088_v26, %v1087_v20  ;;  %v1094_v28 = vadd.f32 %v1093_v38, %v1092_v47  ;;  %v2012_v38 = vmov 0.0|0.0  }
 0x2e6   :  { %v1916_v21 = vpop.eup %1915  ;;  %1768 = vmatprep.subr.bf16.mxu1 %v2012_v38 }
 0x2e7   :  { %1923 = vrcp.f32 %v1089_v40  ;;  %v1095_v53 = vrot.slane %v1094_v28, 2  ;;  %v1100_v12 = vsel %vm1044_vm7, %v1916_v21, 0.0 }
 0x2e8   :  { %v1101_v4 = vadd.f32 %v1100_v12, %v1099_v27  ;;  %v53_v27 = vld [vmem:[#allocation5 + $0x90] sm:$0xff] }
 0x2e9   :  { %v1918_v16 = vpop.eup %1917  ;;  %v1096_v14 = vadd.f32 %v1095_v53, %v1094_v28  ;;  %v51_v28 = vld [vmem:[#allocation5 + $0x70] sm:$0xff]  ;;  %v52_v53 = vld [vmem:[#allocation5 + $0x80] sm:$0xff] }
 0x2ea   :  { %v1127_v22 = vmul.f32 %v1918_v16, %v2515_v6  ;;  %v1128_v36 = vmul.f32 %v1918_v16, %v2518_v49  ;;  %v1102_v58 = vrot.slane %v1101_v4, 4  ;;  %v1920_v60 = vpop.eup %1919  ;;  %v1775_v12 = vpack.c.bf16 %v53_v27, %v52_v53  ;;  %v55_v16 = vld [vmem:[#allocation5 + $0xb0] sm:$0xff] }
 0x2eb   :  { %v1097_v17 = vrot.slane %v1096_v14, 1  ;;  %v1108_v15 = vsel %vm1044_vm7, %v1920_v60, 0.0 }
 0x2ec   :  { %1678 = vmatprep.mubr.msk.f32.mxu0 %vm1044_vm7, %v1127_v22  ;;  %v1103_v61 = vadd.f32 %v1102_v58, %v1101_v4  ;;  %v54_v4 = vld [vmem:[#allocation5 + $0xa0] sm:$0xff] }
 0x2ed   :  { %1679 = vmatmul.mubr.msk.f32.gmra.mrb[38].mxu0 %vm1044_vm7, %v1128_v36  ;;  %v1098_v5 = vadd.f32 %v1097_v17, %v1096_v14  ;;  %v1778_v14 = vpack.c.bf16 %v55_v16, %v54_v4  ;;  %v56_v22 = vld [vmem:[#allocation5 + $0xc0] sm:$0xff]  ;;  %v57_v36 = vld [vmem:[#allocation5 + $0xd0] sm:$0xff] }
 0x2ee   :  { %v1922_v50 = vpop.eup %1921  ;;  %v1104_v10 = vrot.slane %v1103_v61, 2  ;;  %v1781_v58 = vpack.c.bf16 %v57_v36, %v56_v22  ;;  %v58_v17 = vld [vmem:[#allocation5 + $0xe0] sm:$0xff] }
 0x2ef   :  { %1925 = vrcp.f32 %v1098_v5  ;;  %v1109_v31 = vsel %vm1044_vm7, %v1922_v50, 0.0  ;;  %v60_v5 = vld [vmem:[#allocation5 + $0x100] sm:$0xff] }
 0x2f0   :  { %v1105_v51 = vadd.f32 %v1104_v10, %v1103_v61  ;;  %v1110_v6 = vadd.f32 %v1109_v31, %v1108_v15  ;;  %v62_v15 = vld [vmem:[#allocation5 + $0x120] sm:$0xff]  ;;  %v63_v31 = vld [vmem:[#allocation5 + $0x130] sm:$0xff] }
 0x2f1   :  { %v1924_v29 = vpop.eup %1923 }
 0x2f2   :  { %v1130_v49 = vmul.f32 %v1924_v29, %v2526_v8  ;;  %v1131_v11 = vmul.f32 %v1924_v29, %v2533_v43  ;;  %v1106_v46 = vrot.slane %v1105_v51, 1  ;;  %v1111_v55 = vrot.slane %v1110_v6, 4  ;;  %v1931_v29 = vld [vmem:[#allocation5 + $0x344] ss:$8 sm:$0x3] }
 0x2f4   :  { %1681 = vmatprep.mubr.msk.f32.mxu0 %vm1044_vm7, %v1130_v49  ;;  %v1107_v3 = vadd.f32 %v1106_v46, %v1105_v51  ;;  %v1112_v54 = vadd.f32 %v1111_v55, %v1110_v6  ;;  %v1790_v51 = vpack.c.bf16 %v63_v31, %v62_v15  ;;  %v350_v6 = vsub.s32 1, %v2266_v23 }
 0x2f5   :  { %1682 = vmatmul.mubr.msk.f32.gmra.mrb[40].mxu0 %vm1044_vm7, %v1131_v11 }
 0x2f6   :  { %1927 = vrcp.f32 %v1107_v3  ;;  %v1113_v19 = vrot.slane %v1112_v54, 2  ;;  %v2575_v49 = vrot.slane %v1931_v29, %v350_v6 }
 0x2f8   :  { %v1114_v48 = vadd.f32 %v1113_v19, %v1112_v54  ;;  %v477_v11 = vadd.f32 %v2275_v44, %v2575_v49  ;;  %v471_v46 = vadd.f32 %v2272_v33, %v2575_v49  ;;  %v489_v0 = vadd.f32 %v2281_v35, %v2575_v49 }
 0x2f9   :  { %v1926_v34 = vpop.eup %1925  ;;  %v483_v23 = vadd.f32 %v2278_v13, %v2575_v49  ;;  %v513_v27 = vadd.f32 %v2293_v9, %v2575_v49  ;;  %v525_v9 = vadd.f32 %v2299_v59, %v2575_v49  ;;  %v531_v59 = vadd.f32 %v2302_v18, %v2575_v49 }
 0x2fa   :  { %v1133_v1 = vmul.f32 %v1926_v34, %v2540_v52  ;;  %v1134_v62 = vmul.f32 %v1926_v34, %v1910_v41  ;;  %v1115_v20 = vrot.slane %v1114_v48, 1  ;;  %v48_v52 = vld [vmem:[#allocation5 + $0x40] sm:$0xff]  ;;  %v49_v41 = vld [vmem:[#allocation5 + $0x50] sm:$0xff] }
 0x2fb   :  { %v1769_v40 = vpack.c.bf16 %v49_v41, %v48_v52 }
 0x2fc   :  { %1684 = vmatprep.mubr.msk.f32.mxu0 %vm1044_vm7, %v1133_v1  ;;  %v1116_v8 = vadd.f32 %v1115_v20, %v1114_v48 }
 0x2fd   :  { %1685 = vmatmul.mubr.msk.f32.gmra.mrb[42].mxu0 %vm1044_vm7, %v1134_v62  ;;  %1770 = vmatpush3.bf16.msra.mxu1 %v1769_v40 }
 0x2fe   :  { %1929 = vrcp.f32 %v1116_v8  ;;  %1771 = vmatprep.subr.bf16.mxu1 %v2012_v38 }
 0x300   :  { %v1928_v43 = vpop.eup %1927 }
 0x301   :  { %v1136_v47 = vmul.f32 %v1928_v43, %v1914_v57  ;;  %v1137_v7 = vmul.f32 %v1928_v43, %v1916_v21  ;;  %v50_v57 = vld [vmem:[#allocation5 + $0x60] sm:$0xff] }
 0x302   :  { %v1772_v21 = vpack.c.bf16 %v51_v28, %v50_v57 }
 0x303   :  { %1687 = vmatprep.mubr.msk.f32.mxu0 %vm1044_vm7, %v1136_v47 }
 0x304   :  { %1688 = vmatmul.mubr.msk.f32.gmra.mrb[44].mxu0 %vm1044_vm7, %v1137_v7  ;;  %1773 = vmatpush3.bf16.msra.mxu1 %v1772_v21  ;;  %v501_v7 = vadd.f32 %v2287_v45, %v2575_v49  ;;  %v507_v45 = vadd.f32 %v2290_v63, %v2575_v49  ;;  %v519_v63 = vadd.f32 %v2296_v39, %v2575_v49 }
 0x305   :  { %1774 = vmatprep.subr.bf16.mxu1 %v2012_v38 }
 0x308   :  { %v1930_v24 = vpop.eup %1929  ;;  %1776 = vmatpush3.bf16.msra.mxu1 %v1775_v12 }
 0x309   :  { %v1139_v30 = vmul.f32 %v1930_v24, %v1920_v60  ;;  %v1140_v26 = vmul.f32 %v1930_v24, %v1922_v50  ;;  %1777 = vmatprep.subr.bf16.mxu1 %v2012_v38  ;;  %v59_v60 = vld [vmem:[#allocation5 + $0xf0] sm:$0xff]  ;;  %v495_v24 = vadd.f32 %v2284_v56, %v2575_v49 }
 0x30a   :  { %v1784_v61 = vpack.c.bf16 %v59_v60, %v58_v17  ;;  %v61_v50 = vld [vmem:[#allocation5 + $0x110] sm:$0xff] }
 0x30b   :  { %1690 = vmatprep.mubr.msk.f32.mxu0 %vm1044_vm7, %v1139_v30  ;;  %v1787_v10 = vpack.c.bf16 %v61_v50, %v60_v5 }
 0x30c   :  { %1691 = vmatmul.mubr.msk.f32.gmra.mrb[46].mxu0 %vm1044_vm7, %v1140_v26  ;;  %1779 = vmatpush3.bf16.msra.mxu1 %v1778_v14  ;;  %vm1424_vm7 = vcmask 1044484  }
 0x30d   :  { %1780 = vmatprep.subr.bf16.mxu1 %v2012_v38 }
 0x310   :  { %1782 = vmatpush3.bf16.msra.mxu1 %v1781_v58 }
 0x311   :  { %1783 = vmatprep.subr.bf16.mxu1 %v2012_v38 }
 0x314   :  { %1785 = vmatpush3.bf16.msra.mxu1 %v1784_v61 }
 0x315   :  { %1786 = vmatprep.subr.bf16.mxu1 %v2012_v38 }
 0x318   :  { %1788 = vmatpush3.bf16.msra.mxu1 %v1787_v10 }
 0x319   :  { %1789 = vmatprep.subr.bf16.mxu1 %v2012_v38 }
 0x31c   :  { %1791 = vmatpush3.bf16.msra.mxu1 %v1790_v51 }
 0x3a8   :  { %v1671_v55 = vpop.f32.mrb[32].mxu0 }
 0x3a9   :  { %v1339_v3 = vmul.f32 %v1671_v55, %v477_v11  ;;  %v1259_v54 = vpop.f32.mrb[33].mxu0 }
 0x3aa   :  { %v1338_v19 = vmul.f32 %v1259_v54, %v471_v46 }
 0x3ac   :  { %v1354_v48 = vadd.f32 %v1339_v3, %v1338_v19 }
 0x3ae   :  { %v1355_v34 = vrot.slane %v1354_v48, 4 }
 0x3b0   :  { %v1356_v1 = vadd.f32 %v1355_v34, %v1354_v48  ;;  %v1674_v62 = vpop.f32.mrb[34].mxu0  ;;  %v537_v48 = vadd.f32 %v2305_v42, %v2575_v49  ;;  %v543_v42 = vadd.f32 %v2308_v37, %v2575_v49 }
 0x3b1   :  { %v1341_v20 = vmul.f32 %v1674_v62, %v489_v0  ;;  %v1269_v8 = vpop.f32.mrb[35].mxu0 }
 0x3b2   :  { %v1340_v44 = vmul.f32 %v1269_v8, %v483_v23  ;;  %v1357_v43 = vrot.slane %v1356_v1, 2 }
 0x3b4   :  { %v1361_v47 = vadd.f32 %v1341_v20, %v1340_v44  ;;  %v1358_v30 = vadd.f32 %v1357_v43, %v1356_v1 }
 0x3b6   :  { %v1362_v33 = vrot.slane %v1361_v47, 4  ;;  %v1359_v40 = vrot.slane %v1358_v30, 1 }
 0x3b8   :  { %v1363_v26 = vadd.f32 %v1362_v33, %v1361_v47  ;;  %v1677_v35 = vpop.f32.mrb[36].mxu0  ;;  %v1360_v56 = vadd.f32 %v1359_v40, %v1358_v30  ;;  %v549_v47 = vadd.f32 %v2311_v2, %v2575_v49  ;;  %v561_v2 = vadd.f32 %v2317_v32, %v2575_v49 }
 0x3b9   :  { %v1343_v52 = vmul.f32 %v1677_v35, %v501_v7  ;;  %v1279_v41 = vpop.f32.mrb[37].mxu0 }
 0x3ba   :  { %v1364_v13 = vrot.slane %v1363_v26, 2  ;;  %v1342_v38 = vmul.f32 %v1279_v41, %v495_v24 }
 0x3bc   :  { %v1365_v57 = vadd.f32 %v1364_v13, %v1363_v26  ;;  %v1368_v28 = vadd.f32 %v1343_v52, %v1342_v38 }
 0x3be   :  { %v1366_v21 = vrot.slane %v1365_v57, 1  ;;  %v1369_v53 = vrot.slane %v1368_v28, 4 }
 0x3c0   :  { %v1367_v12 = vadd.f32 %v1366_v21, %v1365_v57  ;;  %v1370_v4 = vadd.f32 %v1369_v53, %v1368_v28  ;;  %v1680_v16 = vpop.f32.mrb[38].mxu0  ;;  %v555_v21 = vadd.f32 %v2314_v25, %v2575_v49 }
 0x3c1   :  { %v1345_v14 = vmul.f32 %v1680_v16, %v513_v27  ;;  %v1289_v22 = vpop.f32.mrb[39].mxu0 }
 0x3c2   :  { %v1419_v36 = vsel %vm1418_vm4, %v1367_v12, %v1360_v56  ;;  %v1371_v58 = vrot.slane %v1370_v4, 2  ;;  %v1344_v17 = vmul.f32 %v1289_v22, %v507_v45 }
 0x3c4   :  { %v1372_v60 = vadd.f32 %v1371_v58, %v1370_v4  ;;  %v1375_v61 = vadd.f32 %v1345_v14, %v1344_v17 }
 0x3c6   :  { %v1373_v5 = vrot.slane %v1372_v60, 1  ;;  %v1376_v50 = vrot.slane %v1375_v61, 4 }
 0x3c8   :  { %v1374_v10 = vadd.f32 %v1373_v5, %v1372_v60  ;;  %v1377_v15 = vadd.f32 %v1376_v50, %v1375_v61  ;;  %v1683_v31 = vpop.f32.mrb[40].mxu0 }
 0x3c9   :  { %v1347_v51 = vmul.f32 %v1683_v31, %v525_v9  ;;  %v1299_v6 = vpop.f32.mrb[41].mxu0  ;;  %v99_v9 = vld [vmem:[#allocation5 + $0x345] ss:$0 sm:$0xff] }
 0x3ca   :  { %v1421_v29 = vsel %vm1420_vm5, %v1374_v10, %v1419_v36  ;;  %v1378_v11 = vrot.slane %v1377_v15, 2  ;;  %v1346_v46 = vmul.f32 %v1299_v6, %v519_v63 }
 0x3cc   :  { %v1379_v55 = vadd.f32 %v1378_v11, %v1377_v15  ;;  %v1382_v3 = vadd.f32 %v1347_v51, %v1346_v46 }
 0x3ce   :  { %v1380_v54 = vrot.slane %v1379_v55, 1  ;;  %v1383_v19 = vrot.slane %v1382_v3, 4 }
 0x3d0   :  { %v1381_v39 = vadd.f32 %v1380_v54, %v1379_v55  ;;  %v1384_v34 = vadd.f32 %v1383_v19, %v1382_v3  ;;  %v1686_v0 = vpop.f32.mrb[42].mxu0 }
 0x3d1   :  { %v1349_v23 = vmul.f32 %v1686_v0, %v537_v48  ;;  %v1309_v1 = vpop.f32.mrb[43].mxu0 }
 0x3d2   :  { %v1423_v62 = vsel %vm1422_vm6, %v1381_v39, %v1421_v29  ;;  %v1385_v20 = vrot.slane %v1384_v34, 2  ;;  %v1348_v8 = vmul.f32 %v1309_v1, %v531_v59 }
 0x3d4   :  { %v1386_v44 = vadd.f32 %v1385_v20, %v1384_v34  ;;  %v1389_v43 = vadd.f32 %v1349_v23, %v1348_v8 }
 0x3d6   :  { %v1387_v33 = vrot.slane %v1386_v44, 1  ;;  %v1390_v7 = vrot.slane %v1389_v43, 4 }
 0x3d7   :  { %v1689_v24 = vpop.f32.mrb[44].mxu0 }
 0x3d8   :  { %v1388_v18 = vadd.f32 %v1387_v33, %v1386_v44  ;;  %v1391_v30 = vadd.f32 %v1390_v7, %v1389_v43  ;;  %v1351_v26 = vmul.f32 %v1689_v24, %v549_v47  ;;  %v1319_v35 = vpop.f32.mrb[45].mxu0 }
 0x3d9   :  { %v1350_v52 = vmul.f32 %v1319_v35, %v543_v42 }
 0x3da   :  { %v1392_v41 = vrot.slane %v1391_v30, 2  ;;  %v1425_v13 = vsel %vm1424_vm7, %v1388_v18, %v1423_v62 }
 0x3db   :  { %v1396_v38 = vadd.f32 %v1351_v26, %v1350_v52 }
 0x3dc   :  { %v1393_v40 = vadd.f32 %v1392_v41, %v1391_v30 }
 0x3dd   :  { %v1397_v57 = vrot.slane %v1396_v38, 4 }
 0x3de   :  { %v1394_v28 = vrot.slane %v1393_v40, 1 }
 0x3df   :  { %v1398_v37 = vadd.f32 %v1397_v57, %v1396_v38  ;;  %v1692_v53 = vpop.f32.mrb[46].mxu0 }
 0x3e0   :  { %v1395_v27 = vadd.f32 %v1394_v28, %v1393_v40  ;;  %v1353_v45 = vmul.f32 %v1692_v53, %v561_v2  ;;  %v1329_v56 = vpop.f32.mrb[47].mxu0 }
 0x3e1   :  { %v1399_v12 = vrot.slane %v1398_v37, 2  ;;  %v1352_v4 = vmul.f32 %v1329_v56, %v555_v21 }
 0x3e2   :  { %v1427_v16 = vsel %vm1426_vm8, %v1395_v27, %v1425_v13 }
 0x3e3   :  { %v1400_v14 = vadd.f32 %v1399_v12, %v1398_v37  ;;  %v1403_v22 = vadd.f32 %v1353_v45, %v1352_v4 }
 0x3e5   :  { %v1401_v36 = vrot.slane %v1400_v14, 1  ;;  %v1404_v58 = vrot.slane %v1403_v22, 4 }
 0x3e7   :  { %v1402_v17 = vadd.f32 %v1401_v36, %v1400_v14  ;;  %v1405_v32 = vadd.f32 %v1404_v58, %v1403_v22 }
 0x3e9   :  { %v1406_v60 = vrot.slane %v1405_v32, 2  ;;  %v1429_v61 = vsel %vm1428_vm9, %v1402_v17, %v1427_v16 }
 0x3eb   :  { %v1407_v5 = vadd.f32 %v1406_v60, %v1405_v32 }
 0x3ed   :  { %v1408_v25 = vrot.slane %v1407_v5, 1 }
 0x3ef   :  { %v1409_v49 = vadd.f32 %v1408_v25, %v1407_v5 }
 0x3f1   :  { %v1431_v50 = vsel %vm1430_vm10, %v1409_v49, %v1429_v61 }
 0x3f2   :  { %1726 = vmatmul.mubr.f32.vlgmr.msra.gmra.mrb[32].mxu1 %v1431_v50 }
 0x4c5   :  { %v1499_v63 = vpop.f32.mrb[32].mxu1 }
 0x4c6   :  { %v1500_v10 = vadd.f32 %v1499_v63, %v99_v9  ;;  %v1727_v15 = vpop.f32.mrb[33].mxu1 }
 0x4c8   :  { %1503 = vst [vmem:[#allocation7] sm:$0xff] %v1500_v10 }
 0x4c9   :  { %1987 = shalt.err (!%p1984_p6)
}
 0x4ca   :  { %s1988_s13 = scalar_lea.hbm %s2623_s2, 128 }
 0x4cb   :  { %p1989_p7 = scmp.ne.s32.totalorder %s2623_s2, %s1988_s13  ;;  %p1992_p8 = scmp.lt.u32.totalorder %s1988_s13, %s2623_s2 }
 0x4cd   :  { %p1994_p9 = pnand %p1992_p8, %p1989_p7 }
 0x4cf   :  { %1997 = shalt.err (!%p1994_p9)
}
 0x4d0   :  { %1513 = dma.vmem_to_hbm [thread:$0]  %s1511_s9, 128, %s2623_s2, [#allocation4]  }
 0x4d1   :  { %2002 = dma.done.wait [#allocation4], 128  }
 0x4d2   :  { %2003 = vsyncadd [#allocation4], 4294967168 }
 0x4d3   :  { %1517 = vsyncpa [#allocation3], 1 }
 0x4d4   :  { %1518 = vsyncpa [#allocation6], 1 }
 0x4d5   :  { %1519 = vsyncpa [#allocation4], 1 }

</bundles_post_ra>
